<compile_context>
chip_gen: v5e
topology: v5e:2x2
jax: 0.10.0
libtpu: 0.0.40
codegen_flags: <defaults>
</compile_context>

<pallas_src>
import math
from functools import partial

import jax
import jax.numpy as jnp
from jax.experimental import pallas as pl
from jax.experimental.pallas import tpu as pltpu


# ---------------------------------------------------------------------------
# helpers
# ---------------------------------------------------------------------------
def _round_up(a, b):
    return (a + b - 1) // b * b


def _full_spec(shape):
    """Whole-array block (block == full array dims), for grid=(1,)."""
    nd = len(shape)
    return pl.BlockSpec(shape, lambda i, _nd=nd: (0,) * _nd)


def _im2col(x, k, s, p):
    """x: (B, H, W, C) -> patches (B*Ho*Wo, k*k*C), plus Ho, Wo."""
    b, h, w, c = x.shape
    xp = jnp.pad(x, ((0, 0), (p, p), (p, p), (0, 0)))
    ho = (h + 2 * p - k) // s + 1
    wo = (w + 2 * p - k) // s + 1
    cols = []
    for ky in range(k):
        for kx in range(k):
            cols.append(
                xp[:, ky:ky + (ho - 1) * s + 1:s, kx:kx + (wo - 1) * s + 1:s, :]
            )  # (B, Ho, Wo, C)
    patches = jnp.stack(cols, axis=3)                 # (B, Ho, Wo, k*k, C)
    return patches.reshape(b * ho * wo, k * k * c), ho, wo


# ---------------------------------------------------------------------------
# kernel 1: row-tiled matmul + bias (+ optional ReLU)
#   used for conv-as-matmul (BN scale pre-folded into weight) and for the
#   hoisted GRU input projection.
# ---------------------------------------------------------------------------
def _mm_bias_kernel(x_ref, w_ref, b_ref, o_ref, *, relu):
    y = jnp.dot(x_ref[...], w_ref[...], preferred_element_type=jnp.float32)
    y = y + b_ref[...]
    if relu:
        y = jnp.maximum(y, 0.0)
    o_ref[...] = y.astype(o_ref.dtype)


def matmul_bias(x, w, bias, *, relu, row_tile=512):
    """(N, K) @ (K, Co) + bias(1, Co), row-tiled over N with a parallel grid."""
    n, kdim = x.shape
    co = w.shape[1]

    # pad contraction dim to the f32 sublane tile (8) -> unmasked loads.
    k_pad = _round_up(kdim, 8)
    if k_pad != kdim:
        x = jnp.pad(x, ((0, 0), (0, k_pad - kdim)))
        w = jnp.pad(w, ((0, k_pad - kdim), (0, 0)))

    # row tile: multiple of 8, capped so double-buffered tiles stay well
    # inside the (v7x) 64 MiB VMEM budget (tile*K + tile*Co f32, x2 buffers).
    tile = min(row_tile, _round_up(n, 8))
    n_pad = _round_up(n, tile)
    if n_pad != n:
        x = jnp.pad(x, ((0, n_pad - n), (0, 0)))

    grid = (n_pad // tile,)
    cost = pl.CostEstimate(
        flops=2 * n_pad * k_pad * co,
        transcendentals=0,
        bytes_accessed=4 * (n_pad * k_pad + k_pad * co + n_pad * co + co),
    )
    out = pl.pallas_call(
        partial(_mm_bias_kernel, relu=relu),
        grid=grid,
        in_specs=[
            pl.BlockSpec((tile, k_pad), lambda i: (i, 0)),
            pl.BlockSpec((k_pad, co), lambda i: (0, 0)),
            pl.BlockSpec((1, co), lambda i: (0, 0)),
        ],
        out_specs=pl.BlockSpec((tile, co), lambda i: (i, 0)),
        out_shape=jax.ShapeDtypeStruct((n_pad, co), jnp.float32),
        compiler_params=pltpu.CompilerParams(
            dimension_semantics=("parallel",)),
        cost_estimate=cost,
    )(x, w, bias)
    return out[:n]


# ---------------------------------------------------------------------------
# kernel 2: fused GRU recurrence + Style Token Layer (multi-head attention)
#
#   GRU (PyTorch formulation, gate order [r | z | n] concatenated):
#     gi = x @ Wi + bi            (hoisted, precomputed outside the kernel)
#     gh = h @ Wh + bh
#     r = sig(gi_r + gh_r); z = sig(gi_z + gh_z)
#     n = tanh(gi_n + r * gh_n);  h' = (1 - z) * n + z * h
#
#   STL: q = h_T @ Wq + bq ; k,v from tanh(gst_embs); per-head softmax
#        attention (head-batched), output projection.
# ---------------------------------------------------------------------------
def _gru_stl_kernel(gi_ref, wh_ref, bh_ref, gst_ref, wq_ref, bq_ref,
                    wk_ref, bk_ref, wv_ref, bv_ref, wo_ref, bo_ref,
                    o_ref, *, n_head, d_k, hdim, unroll):
    t_len, b, _ = gi_ref.shape
    f_feat = n_head * d_k

    wh = wh_ref[...]                                   # (H, 3H), hoisted
    bh = bh_ref[...]                                   # (1, 3H)

    def step(t, h):
        gi = gi_ref[t]                                 # (B, 3H) precomputed
        gh = jnp.dot(h, wh, preferred_element_type=jnp.float32) + bh
        r = jax.nn.sigmoid(gi[:, :hdim] + gh[:, :hdim])
        z = jax.nn.sigmoid(gi[:, hdim:2 * hdim] + gh[:, hdim:2 * hdim])
        n = jnp.tanh(gi[:, 2 * hdim:] + r * gh[:, 2 * hdim:])
        return (1.0 - z) * n + z * h

    h0 = jnp.zeros((b, hdim), jnp.float32)
    ref_embs = jax.lax.fori_loop(0, t_len, step, h0, unroll=unroll)  # (B, H)

    # ---- Style Token Layer (ref_embs stays in VMEM) ----
    g = jnp.tanh(gst_ref[...])                                        # (Tk, d_kv)
    tk = g.shape[0]
    q = jnp.dot(ref_embs, wq_ref[...],
                preferred_element_type=jnp.float32) + bq_ref[...]     # (B, F)
    k = jnp.dot(g, wk_ref[...],
                preferred_element_type=jnp.float32) + bk_ref[...]     # (Tk, F)
    v = jnp.dot(g, wv_ref[...],
                preferred_element_type=jnp.float32) + bv_ref[...]     # (Tk, F)

    # head-batched attention: (H, B, d_k) x (H, Tk, d_k)
    qh = jnp.transpose(q.reshape(b, n_head, d_k), (1, 0, 2))
    kh = jnp.transpose(k.reshape(tk, n_head, d_k), (1, 0, 2))
    vh = jnp.transpose(v.reshape(tk, n_head, d_k), (1, 0, 2))

    inv_sqrt_dk = 1.0 / math.sqrt(d_k)
    scores = jnp.einsum("hqd,hkd->hqk", qh, kh,
                        preferred_element_type=jnp.float32) * inv_sqrt_dk
    m = jnp.max(scores, axis=-1, keepdims=True)
    e = jnp.exp(scores - m)
    attn = e / jnp.sum(e, axis=-1, keepdims=True)
    ctx = jnp.einsum("hqk,hkd->hqd", attn, vh,
                     preferred_element_type=jnp.float32)              # (H, B, d_k)
    ctx = jnp.transpose(ctx, (1, 0, 2)).reshape(b, f_feat)            # (B, F)

    o_ref[...] = jnp.dot(ctx, wo_ref[...],
                         preferred_element_type=jnp.float32) + bo_ref[...]


def gru_stl(gi_tbd, gru_p, stl_p, n_head):
    """gi_tbd: (T, B, 3H) precomputed input-gate activations."""
    t, b, threeh = gi_tbd.shape
    hdim = threeh // 3
    f_feat = stl_p["wq"].shape[1]
    d_k = f_feat // n_head
    # partial unroll for long sequences (code-size / vreg pressure, esp. v5e)
    unroll = t if t <= 16 else 8

    kern = partial(_gru_stl_kernel, n_head=n_head, d_k=d_k,
                   hdim=hdim, unroll=unroll)
    operands = (gi_tbd, gru_p["wh"], gru_p["bh"], stl_p["gst_embs"],
                stl_p["wq"], stl_p["bq"], stl_p["wk"], stl_p["bk"],
                stl_p["wv"], stl_p["bv"], stl_p["wo"], stl_p["bo"])
    return pl.pallas_call(
        kern,
        grid=(1,),
        in_specs=[_full_spec(op.shape) for op in operands],
        out_specs=_full_spec((b, f_feat)),
        out_shape=jax.ShapeDtypeStruct((b, f_feat), jnp.float32),
    )(*operands)


# ---------------------------------------------------------------------------
# full StyleEncoder forward
# ---------------------------------------------------------------------------
def style_encoder_forward(speech, params, cfg):
    b, lmax, idim = speech.shape
    x = speech.reshape(b, lmax, idim, 1)                 # NHWC, single channel

    # ReferenceEncoder conv stack: Conv2d(k,s,p,no bias) + (folded)BN + ReLU
    for layer in params["convs"]:
        patches, ho, wo = _im2col(x, cfg["k"], cfg["s"], cfg["p"])
        y = matmul_bias(patches, layer["w"], layer["shift"], relu=True)
        x = y.reshape(b, ho, wo, layer["w"].shape[1])    # (B, T', F', C)

    # torch: (B,C,T',F') -> transpose(1,2) -> (B,T',C,F') -> view(B,T',C*F')
    bsz, tlen, flen, c = x.shape
    hs = jnp.transpose(x, (0, 1, 3, 2)).reshape(bsz, tlen, c * flen)

    # hoisted GRU input projection: one big matmul over all timesteps
    gi = matmul_bias(hs.reshape(bsz * tlen, c * flen),
                     params["gru"]["wi"], params["gru"]["bi"], relu=False)
    gi_tbd = jnp.transpose(gi.reshape(bsz, tlen, -1), (1, 0, 2))  # (T, B, 3H)

    # fused GRU recurrence + style-token attention
    return gru_stl(gi_tbd, params["gru"], params["stl"], cfg["gst_heads"])


# ---------------------------------------------------------------------------
# deterministic parameter init (synthetic; no checkpoint loading)
# ---------------------------------------------------------------------------
def init_params(key, cfg):
    params = {"convs": []}
    eps = 1e-5
    in_ch = 1
    for ch in cfg["conv_chans"]:
        key, k1, k2, k3, k4, k5 = jax.random.split(key, 6)
        fan_in = cfg["k"] * cfg["k"] * in_ch
        w = (1.0 / math.sqrt(fan_in)) * jax.random.normal(
            k1, (cfg["k"], cfg["k"], in_ch, ch), jnp.float32)
        w = w.reshape(cfg["k"] * cfg["k"] * in_ch, ch)
        gamma = 1.0 + 0.1 * jax.random.normal(k2, (ch,), jnp.float32)
        beta = 0.1 * jax.random.normal(k3, (ch,), jnp.float32)
        rmean = 0.1 * jax.random.normal(k4, (ch,), jnp.float32)
        rvar = jnp.abs(1.0 + 0.1 * jax.random.normal(k5, (ch,), jnp.float32))
        scale = gamma / jnp.sqrt(rvar + eps)
        shift = beta - rmean * scale
        # fold eval-mode BN scale into the weight columns; kernel only +shift
        params["convs"].append({"w": w * scale[None, :],
                                "shift": shift.reshape(1, ch)})
        in_ch = ch

    # GRU input size = (idim reduced by conv stack) * last conv channels
    f = cfg["idim"]
    for _ in cfg["conv_chans"]:
        f = (f - cfg["k"] + 2 * cfg["p"]) // cfg["s"] + 1
    gru_in = f * cfg["conv_chans"][-1]
    h = cfg["gru_units"]
    key, k1, k2, k3, k4 = jax.random.split(key, 5)
    sh = 1.0 / math.sqrt(h)
    # gate slabs concatenated in order [r | z | n]
    params["gru"] = {
        "wi": sh * jax.random.normal(k1, (gru_in, 3 * h), jnp.float32),
        "wh": sh * jax.random.normal(k2, (h, 3 * h), jnp.float32),
        "bi": sh * jax.random.normal(k3, (1, 3 * h), jnp.float32),
        "bh": sh * jax.random.normal(k4, (1, 3 * h), jnp.float32),
    }

    f_feat = cfg["gst_token_dim"]
    d_kv = f_feat // cfg["gst_heads"]
    key, k1, k2, k3, k4, k5, k6, k7, k8, k9 = jax.random.split(key, 10)
    params["stl"] = {
        "gst_embs": jax.random.normal(k1, (cfg["gst_tokens"], d_kv), jnp.float32),
        "wq": (1.0 / math.sqrt(h)) * jax.random.normal(k2, (h, f_feat), jnp.float32),
        "bq": 0.01 * jax.random.normal(k3, (1, f_feat), jnp.float32),
        "wk": (1.0 / math.sqrt(d_kv)) * jax.random.normal(k4, (d_kv, f_feat), jnp.float32),
        "bk": 0.01 * jax.random.normal(k5, (1, f_feat), jnp.float32),
        "wv": (1.0 / math.sqrt(d_kv)) * jax.random.normal(k6, (d_kv, f_feat), jnp.float32),
        "bv": 0.01 * jax.random.normal(k7, (1, f_feat), jnp.float32),
        "wo": (1.0 / math.sqrt(f_feat)) * jax.random.normal(k8, (f_feat, f_feat), jnp.float32),
        "bo": 0.01 * jax.random.normal(k9, (1, f_feat), jnp.float32),
    }
    return params, key


# ---------------------------------------------------------------------------
if __name__ == "__main__":
    # small config consistent with the module structure
    cfg = dict(idim=16, lmax=16, batch=2,
               k=3, s=2, p=1, conv_chans=(4, 8, 8),
               gru_units=32, gst_tokens=10, gst_token_dim=32, gst_heads=4)

    key = jax.random.PRNGKey(0)
    params, key = init_params(key, cfg)
    key, sk = jax.random.split(key)
    speech = jax.random.normal(sk, (cfg["batch"], cfg["lmax"], cfg["idim"]),
                               jnp.float32)

    fwd = jax.jit(partial(style_encoder_forward, cfg=cfg))
    out = jax.block_until_ready(fwd(speech, params))

    assert out.shape == (cfg["batch"], cfg["gst_token_dim"]), out.shape
    assert bool(jnp.all(jnp.isfinite(out)))
    print("KERNEL_OK")
</pallas_src>

<mosaic_0001>
module attributes {stable_mosaic.version = 11 : i64} {
  func.func @_mm_bias_kernel(%arg0: i32, %arg1: memref<128x16xf32, #tpu.memory_space<vmem>>, %arg2: memref<16x4xf32, #tpu.memory_space<vmem>>, %arg3: memref<1x4xf32, #tpu.memory_space<vmem>>, %arg4: memref<128x4xf32, #tpu.memory_space<vmem>>) attributes {dimension_semantics = [#tpu.dimension_semantics<parallel>], iteration_bounds = array<i64: 1>, scalar_prefetch = 0 : i64, scratch_operands = 0 : i64, tpu.core_type = #tpu.core_type<tc>, window_params = [{transform_indices = @transform_0, window_bounds = array<i64: 128, 16>}, {pipeline_mode = #tpu.pipeline_mode<synchronous>, transform_indices = @transform_1, window_bounds = array<i64: 16, 4>}, {pipeline_mode = #tpu.pipeline_mode<synchronous>, transform_indices = @transform_2, window_bounds = array<i64: 1, 4>}, {transform_indices = @transform_3, window_bounds = array<i64: 128, 4>}]} {
    %c0 = arith.constant 0 : index
    %c0_0 = arith.constant 0 : index
    %0 = vector.load %arg1[%c0, %c0_0] : memref<128x16xf32, #tpu.memory_space<vmem>>, vector<128x16xf32>
    %c0_1 = arith.constant 0 : index
    %c0_2 = arith.constant 0 : index
    %1 = vector.load %arg2[%c0_1, %c0_2] : memref<16x4xf32, #tpu.memory_space<vmem>>, vector<16x4xf32>
    %cst = arith.constant dense<0.000000e+00> : vector<128x4xf32>
    %2 = tpu.matmul %0, %1, %cst {dimension_numbers = #tpu.dot_dimension_numbers<[1], [0], [0], [1], [0, 0, 1, 1], [], []>} : vector<128x16xf32>, vector<16x4xf32>, vector<128x4xf32> -> vector<128x4xf32>
    %c0_3 = arith.constant 0 : index
    %c0_4 = arith.constant 0 : index
    %3 = vector.load %arg3[%c0_3, %c0_4] : memref<1x4xf32, #tpu.memory_space<vmem>>, vector<1x4xf32>
    %4 = vector.broadcast %3 : vector<1x4xf32> to vector<128x4xf32>
    %5 = arith.addf %2, %4 : vector<128x4xf32>
    %cst_5 = arith.constant 0.000000e+00 : f32
    %6 = vector.broadcast %cst_5 : f32 to vector<128x4xf32>
    %7 = arith.maximumf %5, %6 : vector<128x4xf32>
    %c0_6 = arith.constant 0 : index
    %c0_7 = arith.constant 0 : index
    %8 = vector.load %arg4[%c0_6, %c0_7] : memref<128x4xf32, #tpu.memory_space<vmem>>, vector<128x4xf32>
    tpu.vector_store %arg4[%c0_6, %c0_7], %7 {strides = array<i32>} : memref<128x4xf32, #tpu.memory_space<vmem>>, vector<128x4xf32>,
    return
  }
  func.func @transform_0(%arg0: i32) -> (i32, i32) {
    %c0_i32 = arith.constant 0 : i32
    %c0_i32_0 = arith.constant 0 : i32
    return %arg0, %c0_i32 : i32, i32
  }
  func.func @transform_1(%arg0: i32) -> (i32, i32) {
    %c0_i32 = arith.constant 0 : i32
    %c0_i32_0 = arith.constant 0 : i32
    %c0_i32_1 = arith.constant 0 : i32
    return %c0_i32, %c0_i32_0 : i32, i32
  }
  func.func @transform_2(%arg0: i32) -> (i32, i32) {
    %c0_i32 = arith.constant 0 : i32
    %c0_i32_0 = arith.constant 0 : i32
    %c0_i32_1 = arith.constant 0 : i32
    return %c0_i32, %c0_i32_0 : i32, i32
  }
  func.func @transform_3(%arg0: i32) -> (i32, i32) {
    %c0_i32 = arith.constant 0 : i32
    %c0_i32_0 = arith.constant 0 : i32
    return %arg0, %c0_i32 : i32, i32
  }
}

module attributes {stable_mosaic.version = 11 : i64} {
  func.func @_mm_bias_kernel(%arg0: i32, %arg1: memref<32x40xf32, #tpu.memory_space<vmem>>, %arg2: memref<40x8xf32, #tpu.memory_space<vmem>>, %arg3: memref<1x8xf32, #tpu.memory_space<vmem>>, %arg4: memref<32x8xf32, #tpu.memory_space<vmem>>) attributes {dimension_semantics = [#tpu.dimension_semantics<parallel>], iteration_bounds = array<i64: 1>, scalar_prefetch = 0 : i64, scratch_operands = 0 : i64, tpu.core_type = #tpu.core_type<tc>, window_params = [{transform_indices = @transform_0, window_bounds = array<i64: 32, 40>}, {pipeline_mode = #tpu.pipeline_mode<synchronous>, transform_indices = @transform_1, window_bounds = array<i64: 40, 8>}, {pipeline_mode = #tpu.pipeline_mode<synchronous>, transform_indices = @transform_2, window_bounds = array<i64: 1, 8>}, {transform_indices = @transform_3, window_bounds = array<i64: 32, 8>}]} {
    %c0 = arith.constant 0 : index
    %c0_0 = arith.constant 0 : index
    %0 = vector.load %arg1[%c0, %c0_0] : memref<32x40xf32, #tpu.memory_space<vmem>>, vector<32x40xf32>
    %c0_1 = arith.constant 0 : index
    %c0_2 = arith.constant 0 : index
    %1 = vector.load %arg2[%c0_1, %c0_2] : memref<40x8xf32, #tpu.memory_space<vmem>>, vector<40x8xf32>
    %cst = arith.constant dense<0.000000e+00> : vector<32x8xf32>
    %2 = tpu.matmul %0, %1, %cst {dimension_numbers = #tpu.dot_dimension_numbers<[1], [0], [0], [1], [0, 0, 1, 1], [], []>} : vector<32x40xf32>, vector<40x8xf32>, vector<32x8xf32> -> vector<32x8xf32>
    %c0_3 = arith.constant 0 : index
    %c0_4 = arith.constant 0 : index
    %3 = vector.load %arg3[%c0_3, %c0_4] : memref<1x8xf32, #tpu.memory_space<vmem>>, vector<1x8xf32>
    %4 = vector.broadcast %3 : vector<1x8xf32> to vector<32x8xf32>
    %5 = arith.addf %2, %4 : vector<32x8xf32>
    %cst_5 = arith.constant 0.000000e+00 : f32
    %6 = vector.broadcast %cst_5 : f32 to vector<32x8xf32>
    %7 = arith.maximumf %5, %6 : vector<32x8xf32>
    %c0_6 = arith.constant 0 : index
    %c0_7 = arith.constant 0 : index
    %8 = vector.load %arg4[%c0_6, %c0_7] : memref<32x8xf32, #tpu.memory_space<vmem>>, vector<32x8xf32>
    tpu.vector_store %arg4[%c0_6, %c0_7], %7 {strides = array<i32>} : memref<32x8xf32, #tpu.memory_space<vmem>>, vector<32x8xf32>,
    return
  }
  func.func @transform_0(%arg0: i32) -> (i32, i32) {
    %c0_i32 = arith.constant 0 : i32
    %c0_i32_0 = arith.constant 0 : i32
    return %arg0, %c0_i32 : i32, i32
  }
  func.func @transform_1(%arg0: i32) -> (i32, i32) {
    %c0_i32 = arith.constant 0 : i32
    %c0_i32_0 = arith.constant 0 : i32
    %c0_i32_1 = arith.constant 0 : i32
    return %c0_i32, %c0_i32_0 : i32, i32
  }
  func.func @transform_2(%arg0: i32) -> (i32, i32) {
    %c0_i32 = arith.constant 0 : i32
    %c0_i32_0 = arith.constant 0 : i32
    %c0_i32_1 = arith.constant 0 : i32
    return %c0_i32, %c0_i32_0 : i32, i32
  }
  func.func @transform_3(%arg0: i32) -> (i32, i32) {
    %c0_i32 = arith.constant 0 : i32
    %c0_i32_0 = arith.constant 0 : i32
    return %arg0, %c0_i32 : i32, i32
  }
}

module attributes {stable_mosaic.version = 11 : i64} {
  func.func @_mm_bias_kernel(%arg0: i32, %arg1: memref<8x72xf32, #tpu.memory_space<vmem>>, %arg2: memref<72x8xf32, #tpu.memory_space<vmem>>, %arg3: memref<1x8xf32, #tpu.memory_space<vmem>>, %arg4: memref<8x8xf32, #tpu.memory_space<vmem>>) attributes {dimension_semantics = [#tpu.dimension_semantics<parallel>], iteration_bounds = array<i64: 1>, scalar_prefetch = 0 : i64, scratch_operands = 0 : i64, tpu.core_type = #tpu.core_type<tc>, window_params = [{transform_indices = @transform_0, window_bounds = array<i64: 8, 72>}, {pipeline_mode = #tpu.pipeline_mode<synchronous>, transform_indices = @transform_1, window_bounds = array<i64: 72, 8>}, {pipeline_mode = #tpu.pipeline_mode<synchronous>, transform_indices = @transform_2, window_bounds = array<i64: 1, 8>}, {transform_indices = @transform_3, window_bounds = array<i64: 8, 8>}]} {
    %c0 = arith.constant 0 : index
    %c0_0 = arith.constant 0 : index
    %0 = vector.load %arg1[%c0, %c0_0] : memref<8x72xf32, #tpu.memory_space<vmem>>, vector<8x72xf32>
    %c0_1 = arith.constant 0 : index
    %c0_2 = arith.constant 0 : index
    %1 = vector.load %arg2[%c0_1, %c0_2] : memref<72x8xf32, #tpu.memory_space<vmem>>, vector<72x8xf32>
    %cst = arith.constant dense<0.000000e+00> : vector<8x8xf32>
    %2 = tpu.matmul %0, %1, %cst {dimension_numbers = #tpu.dot_dimension_numbers<[1], [0], [0], [1], [0, 0, 1, 1], [], []>} : vector<8x72xf32>, vector<72x8xf32>, vector<8x8xf32> -> vector<8x8xf32>
    %c0_3 = arith.constant 0 : index
    %c0_4 = arith.constant 0 : index
    %3 = vector.load %arg3[%c0_3, %c0_4] : memref<1x8xf32, #tpu.memory_space<vmem>>, vector<1x8xf32>
    %4 = vector.broadcast %3 : vector<1x8xf32> to vector<8x8xf32>
    %5 = arith.addf %2, %4 : vector<8x8xf32>
    %cst_5 = arith.constant 0.000000e+00 : f32
    %6 = vector.broadcast %cst_5 : f32 to vector<8x8xf32>
    %7 = arith.maximumf %5, %6 : vector<8x8xf32>
    %c0_6 = arith.constant 0 : index
    %c0_7 = arith.constant 0 : index
    %8 = vector.load %arg4[%c0_6, %c0_7] : memref<8x8xf32, #tpu.memory_space<vmem>>, vector<8x8xf32>
    tpu.vector_store %arg4[%c0_6, %c0_7], %7 {strides = array<i32>} : memref<8x8xf32, #tpu.memory_space<vmem>>, vector<8x8xf32>,
    return
  }
  func.func @transform_0(%arg0: i32) -> (i32, i32) {
    %c0_i32 = arith.constant 0 : i32
    %c0_i32_0 = arith.constant 0 : i32
    return %arg0, %c0_i32 : i32, i32
  }
  func.func @transform_1(%arg0: i32) -> (i32, i32) {
    %c0_i32 = arith.constant 0 : i32
    %c0_i32_0 = arith.constant 0 : i32
    %c0_i32_1 = arith.constant 0 : i32
    return %c0_i32, %c0_i32_0 : i32, i32
  }
  func.func @transform_2(%arg0: i32) -> (i32, i32) {
    %c0_i32 = arith.constant 0 : i32
    %c0_i32_0 = arith.constant 0 : i32
    %c0_i32_1 = arith.constant 0 : i32
    return %c0_i32, %c0_i32_0 : i32, i32
  }
  func.func @transform_3(%arg0: i32) -> (i32, i32) {
    %c0_i32 = arith.constant 0 : i32
    %c0_i32_0 = arith.constant 0 : i32
    return %arg0, %c0_i32 : i32, i32
  }
}

module attributes {stable_mosaic.version = 11 : i64} {
  func.func @_mm_bias_kernel(%arg0: i32, %arg1: memref<8x16xf32, #tpu.memory_space<vmem>>, %arg2: memref<16x96xf32, #tpu.memory_space<vmem>>, %arg3: memref<1x96xf32, #tpu.memory_space<vmem>>, %arg4: memref<8x96xf32, #tpu.memory_space<vmem>>) attributes {dimension_semantics = [#tpu.dimension_semantics<parallel>], iteration_bounds = array<i64: 1>, scalar_prefetch = 0 : i64, scratch_operands = 0 : i64, tpu.core_type = #tpu.core_type<tc>, window_params = [{transform_indices = @transform_0, window_bounds = array<i64: 8, 16>}, {pipeline_mode = #tpu.pipeline_mode<synchronous>, transform_indices = @transform_1, window_bounds = array<i64: 16, 96>}, {pipeline_mode = #tpu.pipeline_mode<synchronous>, transform_indices = @transform_2, window_bounds = array<i64: 1, 96>}, {transform_indices = @transform_3, window_bounds = array<i64: 8, 96>}]} {
    %c0 = arith.constant 0 : index
    %c0_0 = arith.constant 0 : index
    %0 = vector.load %arg1[%c0, %c0_0] : memref<8x16xf32, #tpu.memory_space<vmem>>, vector<8x16xf32>
    %c0_1 = arith.constant 0 : index
    %c0_2 = arith.constant 0 : index
    %1 = vector.load %arg2[%c0_1, %c0_2] : memref<16x96xf32, #tpu.memory_space<vmem>>, vector<16x96xf32>
    %cst = arith.constant dense<0.000000e+00> : vector<8x96xf32>
    %2 = tpu.matmul %0, %1, %cst {dimension_numbers = #tpu.dot_dimension_numbers<[1], [0], [0], [1], [0, 0, 1, 1], [], []>} : vector<8x16xf32>, vector<16x96xf32>, vector<8x96xf32> -> vector<8x96xf32>
    %c0_3 = arith.constant 0 : index
    %c0_4 = arith.constant 0 : index
    %3 = vector.load %arg3[%c0_3, %c0_4] : memref<1x96xf32, #tpu.memory_space<vmem>>, vector<1x96xf32>
    %4 = vector.broadcast %3 : vector<1x96xf32> to vector<8x96xf32>
    %5 = arith.addf %2, %4 : vector<8x96xf32>
    %c0_5 = arith.constant 0 : index
    %c0_6 = arith.constant 0 : index
    %6 = vector.load %arg4[%c0_5, %c0_6] : memref<8x96xf32, #tpu.memory_space<vmem>>, vector<8x96xf32>
    tpu.vector_store %arg4[%c0_5, %c0_6], %5 {strides = array<i32>} : memref<8x96xf32, #tpu.memory_space<vmem>>, vector<8x96xf32>,
    return
  }
  func.func @transform_0(%arg0: i32) -> (i32, i32) {
    %c0_i32 = arith.constant 0 : i32
    %c0_i32_0 = arith.constant 0 : i32
    return %arg0, %c0_i32 : i32, i32
  }
  func.func @transform_1(%arg0: i32) -> (i32, i32) {
    %c0_i32 = arith.constant 0 : i32
    %c0_i32_0 = arith.constant 0 : i32
    %c0_i32_1 = arith.constant 0 : i32
    return %c0_i32, %c0_i32_0 : i32, i32
  }
  func.func @transform_2(%arg0: i32) -> (i32, i32) {
    %c0_i32 = arith.constant 0 : i32
    %c0_i32_0 = arith.constant 0 : i32
    %c0_i32_1 = arith.constant 0 : i32
    return %c0_i32, %c0_i32_0 : i32, i32
  }
  func.func @transform_3(%arg0: i32) -> (i32, i32) {
    %c0_i32 = arith.constant 0 : i32
    %c0_i32_0 = arith.constant 0 : i32
    return %arg0, %c0_i32 : i32, i32
  }
}

module attributes {stable_mosaic.version = 11 : i64} {
  func.func @_gru_stl_kernel(%arg0: i32, %arg1: memref<2x2x96xf32, #tpu.memory_space<vmem>>, %arg2: memref<32x96xf32, #tpu.memory_space<vmem>>, %arg3: memref<1x96xf32, #tpu.memory_space<vmem>>, %arg4: memref<10x8xf32, #tpu.memory_space<vmem>>, %arg5: memref<32x32xf32, #tpu.memory_space<vmem>>, %arg6: memref<1x32xf32, #tpu.memory_space<vmem>>, %arg7: memref<8x32xf32, #tpu.memory_space<vmem>>, %arg8: memref<1x32xf32, #tpu.memory_space<vmem>>, %arg9: memref<8x32xf32, #tpu.memory_space<vmem>>, %arg10: memref<1x32xf32, #tpu.memory_space<vmem>>, %arg11: memref<32x32xf32, #tpu.memory_space<vmem>>, %arg12: memref<1x32xf32, #tpu.memory_space<vmem>>, %arg13: memref<2x32xf32, #tpu.memory_space<vmem>>) attributes {dimension_semantics = [#tpu.dimension_semantics<arbitrary>], iteration_bounds = array<i64: 1>, scalar_prefetch = 0 : i64, scratch_operands = 0 : i64, tpu.core_type = #tpu.core_type<tc>, window_params = [{pipeline_mode = #tpu.pipeline_mode<synchronous>, transform_indices = @transform_0, window_bounds = array<i64: 2, 2, 96>}, {pipeline_mode = #tpu.pipeline_mode<synchronous>, transform_indices = @transform_1, window_bounds = array<i64: 32, 96>}, {pipeline_mode = #tpu.pipeline_mode<synchronous>, transform_indices = @transform_2, window_bounds = array<i64: 1, 96>}, {pipeline_mode = #tpu.pipeline_mode<synchronous>, transform_indices = @transform_3, window_bounds = array<i64: 10, 8>}, {pipeline_mode = #tpu.pipeline_mode<synchronous>, transform_indices = @transform_4, window_bounds = array<i64: 32, 32>}, {pipeline_mode = #tpu.pipeline_mode<synchronous>, transform_indices = @transform_5, window_bounds = array<i64: 1, 32>}, {pipeline_mode = #tpu.pipeline_mode<synchronous>, transform_indices = @transform_6, window_bounds = array<i64: 8, 32>}, {pipeline_mode = #tpu.pipeline_mode<synchronous>, transform_indices = @transform_7, window_bounds = array<i64: 1, 32>}, {pipeline_mode = #tpu.pipeline_mode<synchronous>, transform_indices = @transform_8, window_bounds = array<i64: 8, 32>}, {pipeline_mode = #tpu.pipeline_mode<synchronous>, transform_indices = @transform_9, window_bounds = array<i64: 1, 32>}, {pipeline_mode = #tpu.pipeline_mode<synchronous>, transform_indices = @transform_10, window_bounds = array<i64: 32, 32>}, {pipeline_mode = #tpu.pipeline_mode<synchronous>, transform_indices = @transform_11, window_bounds = array<i64: 1, 32>}, {pipeline_mode = #tpu.pipeline_mode<synchronous>, transform_indices = @transform_12, window_bounds = array<i64: 2, 32>}]} {
    %c0 = arith.constant 0 : index
    %c0_0 = arith.constant 0 : index
    %0 = vector.load %arg2[%c0, %c0_0] : memref<32x96xf32, #tpu.memory_space<vmem>>, vector<32x96xf32>
    %c0_1 = arith.constant 0 : index
    %c0_2 = arith.constant 0 : index
    %1 = vector.load %arg3[%c0_1, %c0_2] : memref<1x96xf32, #tpu.memory_space<vmem>>, vector<1x96xf32>
    %cst = arith.constant 0.000000e+00 : f32
    %2 = vector.broadcast %cst : f32 to vector<2x32xf32>
    %c0_i32 = arith.constant 0 : i32
    %3 = arith.index_cast %c0_i32 : i32 to index
    %c0_3 = arith.constant 0 : index
    %c0_4 = arith.constant 0 : index
    %4 = vector.load %arg1[%3, %c0_3, %c0_4] : memref<2x2x96xf32, #tpu.memory_space<vmem>>, vector<1x2x96xf32>
    %5 = vector.shape_cast %4 : vector<1x2x96xf32> to vector<2x96xf32>
    %cst_5 = arith.constant dense<0.000000e+00> : vector<2x96xf32>
    %6 = tpu.matmul %2, %0, %cst_5 {dimension_numbers = #tpu.dot_dimension_numbers<[1], [0], [0], [1], [0, 0, 1, 1], [], []>} : vector<2x32xf32>, vector<32x96xf32>, vector<2x96xf32> -> vector<2x96xf32>
    %7 = vector.broadcast %1 : vector<1x96xf32> to vector<2x96xf32>
    %8 = arith.addf %6, %7 : vector<2x96xf32>
    %9 = vector.extract_strided_slice %5 {offsets = [0, 0], sizes = [2, 32], strides = [1, 1]} : vector<2x96xf32> to vector<2x32xf32>
    %10 = vector.extract_strided_slice %8 {offsets = [0, 0], sizes = [2, 32], strides = [1, 1]} : vector<2x96xf32> to vector<2x32xf32>
    %11 = arith.addf %9, %10 : vector<2x32xf32>
    %12 = arith.negf %11 : vector<2x32xf32>
    %13 = math.exp %12 : vector<2x32xf32>
    %cst_6 = arith.constant 1.000000e+00 : f32
    %14 = vector.broadcast %cst_6 : f32 to vector<2x32xf32>
    %15 = arith.addf %14, %13 : vector<2x32xf32>
    %16 = arith.divf %14, %15 : vector<2x32xf32>
    %17 = vector.extract_strided_slice %5 {offsets = [0, 32], sizes = [2, 32], strides = [1, 1]} : vector<2x96xf32> to vector<2x32xf32>
    %18 = vector.extract_strided_slice %8 {offsets = [0, 32], sizes = [2, 32], strides = [1, 1]} : vector<2x96xf32> to vector<2x32xf32>
    %19 = arith.addf %17, %18 : vector<2x32xf32>
    %20 = arith.negf %19 : vector<2x32xf32>
    %21 = math.exp %20 : vector<2x32xf32>
    %cst_7 = arith.constant 1.000000e+00 : f32
    %22 = vector.broadcast %cst_7 : f32 to vector<2x32xf32>
    %23 = arith.addf %22, %21 : vector<2x32xf32>
    %24 = arith.divf %22, %23 : vector<2x32xf32>
    %25 = vector.extract_strided_slice %5 {offsets = [0, 64], sizes = [2, 32], strides = [1, 1]} : vector<2x96xf32> to vector<2x32xf32>
    %26 = vector.extract_strided_slice %8 {offsets = [0, 64], sizes = [2, 32], strides = [1, 1]} : vector<2x96xf32> to vector<2x32xf32>
    %27 = arith.mulf %16, %26 : vector<2x32xf32>
    %28 = arith.addf %25, %27 : vector<2x32xf32>
    %29 = math.tanh %28 : vector<2x32xf32>
    %cst_8 = arith.constant 1.000000e+00 : f32
    %30 = vector.broadcast %cst_8 : f32 to vector<2x32xf32>
    %31 = arith.subf %30, %24 : vector<2x32xf32>
    %32 = arith.mulf %31, %29 : vector<2x32xf32>
    %33 = arith.mulf %24, %2 : vector<2x32xf32>
    %34 = arith.addf %32, %33 : vector<2x32xf32>
    %c1_i32 = arith.constant 1 : i32
    %35 = arith.index_cast %c1_i32 : i32 to index
    %c0_9 = arith.constant 0 : index
    %c0_10 = arith.constant 0 : index
    %36 = vector.load %arg1[%35, %c0_9, %c0_10] : memref<2x2x96xf32, #tpu.memory_space<vmem>>, vector<1x2x96xf32>
    %37 = vector.shape_cast %36 : vector<1x2x96xf32> to vector<2x96xf32>
    %cst_11 = arith.constant dense<0.000000e+00> : vector<2x96xf32>
    %38 = tpu.matmul %34, %0, %cst_11 {dimension_numbers = #tpu.dot_dimension_numbers<[1], [0], [0], [1], [0, 0, 1, 1], [], []>} : vector<2x32xf32>, vector<32x96xf32>, vector<2x96xf32> -> vector<2x96xf32>
    %39 = vector.broadcast %1 : vector<1x96xf32> to vector<2x96xf32>
    %40 = arith.addf %38, %39 : vector<2x96xf32>
    %41 = vector.extract_strided_slice %37 {offsets = [0, 0], sizes = [2, 32], strides = [1, 1]} : vector<2x96xf32> to vector<2x32xf32>
    %42 = vector.extract_strided_slice %40 {offsets = [0, 0], sizes = [2, 32], strides = [1, 1]} : vector<2x96xf32> to vector<2x32xf32>
    %43 = arith.addf %41, %42 : vector<2x32xf32>
    %44 = arith.negf %43 : vector<2x32xf32>
    %45 = math.exp %44 : vector<2x32xf32>
    %cst_12 = arith.constant 1.000000e+00 : f32
    %46 = vector.broadcast %cst_12 : f32 to vector<2x32xf32>
    %47 = arith.addf %46, %45 : vector<2x32xf32>
    %48 = arith.divf %46, %47 : vector<2x32xf32>
    %49 = vector.extract_strided_slice %37 {offsets = [0, 32], sizes = [2, 32], strides = [1, 1]} : vector<2x96xf32> to vector<2x32xf32>
    %50 = vector.extract_strided_slice %40 {offsets = [0, 32], sizes = [2, 32], strides = [1, 1]} : vector<2x96xf32> to vector<2x32xf32>
    %51 = arith.addf %49, %50 : vector<2x32xf32>
    %52 = arith.negf %51 : vector<2x32xf32>
    %53 = math.exp %52 : vector<2x32xf32>
    %cst_13 = arith.constant 1.000000e+00 : f32
    %54 = vector.broadcast %cst_13 : f32 to vector<2x32xf32>
    %55 = arith.addf %54, %53 : vector<2x32xf32>
    %56 = arith.divf %54, %55 : vector<2x32xf32>
    %57 = vector.extract_strided_slice %37 {offsets = [0, 64], sizes = [2, 32], strides = [1, 1]} : vector<2x96xf32> to vector<2x32xf32>
    %58 = vector.extract_strided_slice %40 {offsets = [0, 64], sizes = [2, 32], strides = [1, 1]} : vector<2x96xf32> to vector<2x32xf32>
    %59 = arith.mulf %48, %58 : vector<2x32xf32>
    %60 = arith.addf %57, %59 : vector<2x32xf32>
    %61 = math.tanh %60 : vector<2x32xf32>
    %cst_14 = arith.constant 1.000000e+00 : f32
    %62 = vector.broadcast %cst_14 : f32 to vector<2x32xf32>
    %63 = arith.subf %62, %56 : vector<2x32xf32>
    %64 = arith.mulf %63, %61 : vector<2x32xf32>
    %65 = arith.mulf %56, %34 : vector<2x32xf32>
    %66 = arith.addf %64, %65 : vector<2x32xf32>
    %c2_i32 = arith.constant 2 : i32
    %c0_15 = arith.constant 0 : index
    %c0_16 = arith.constant 0 : index
    %67 = vector.load %arg4[%c0_15, %c0_16] : memref<10x8xf32, #tpu.memory_space<vmem>>, vector<10x8xf32>
    %68 = math.tanh %67 : vector<10x8xf32>
    %c0_17 = arith.constant 0 : index
    %c0_18 = arith.constant 0 : index
    %69 = vector.load %arg5[%c0_17, %c0_18] : memref<32x32xf32, #tpu.memory_space<vmem>>, vector<32x32xf32>
    %cst_19 = arith.constant dense<0.000000e+00> : vector<2x32xf32>
    %70 = tpu.matmul %66, %69, %cst_19 {dimension_numbers = #tpu.dot_dimension_numbers<[1], [0], [0], [1], [0, 0, 1, 1], [], []>} : vector<2x32xf32>, vector<32x32xf32>, vector<2x32xf32> -> vector<2x32xf32>
    %c0_20 = arith.constant 0 : index
    %c0_21 = arith.constant 0 : index
    %71 = vector.load %arg6[%c0_20, %c0_21] : memref<1x32xf32, #tpu.memory_space<vmem>>, vector<1x32xf32>
    %72 = vector.broadcast %71 : vector<1x32xf32> to vector<2x32xf32>
    %73 = arith.addf %70, %72 : vector<2x32xf32>
    %c0_22 = arith.constant 0 : index
    %c0_23 = arith.constant 0 : index
    %74 = vector.load %arg7[%c0_22, %c0_23] : memref<8x32xf32, #tpu.memory_space<vmem>>, vector<8x32xf32>
    %cst_24 = arith.constant dense<0.000000e+00> : vector<10x32xf32>
    %75 = tpu.matmul %68, %74, %cst_24 {dimension_numbers = #tpu.dot_dimension_numbers<[1], [0], [0], [1], [0, 0, 1, 1], [], []>} : vector<10x8xf32>, vector<8x32xf32>, vector<10x32xf32> -> vector<10x32xf32>
    %c0_25 = arith.constant 0 : index
    %c0_26 = arith.constant 0 : index
    %76 = vector.load %arg8[%c0_25, %c0_26] : memref<1x32xf32, #tpu.memory_space<vmem>>, vector<1x32xf32>
    %77 = vector.broadcast %76 : vector<1x32xf32> to vector<10x32xf32>
    %78 = arith.addf %75, %77 : vector<10x32xf32>
    %c0_27 = arith.constant 0 : index
    %c0_28 = arith.constant 0 : index
    %79 = vector.load %arg9[%c0_27, %c0_28] : memref<8x32xf32, #tpu.memory_space<vmem>>, vector<8x32xf32>
    %cst_29 = arith.constant dense<0.000000e+00> : vector<10x32xf32>
    %80 = tpu.matmul %68, %79, %cst_29 {dimension_numbers = #tpu.dot_dimension_numbers<[1], [0], [0], [1], [0, 0, 1, 1], [], []>} : vector<10x8xf32>, vector<8x32xf32>, vector<10x32xf32> -> vector<10x32xf32>
    %c0_30 = arith.constant 0 : index
    %c0_31 = arith.constant 0 : index
    %81 = vector.load %arg10[%c0_30, %c0_31] : memref<1x32xf32, #tpu.memory_space<vmem>>, vector<1x32xf32>
    %82 = vector.broadcast %81 : vector<1x32xf32> to vector<10x32xf32>
    %83 = arith.addf %80, %82 : vector<10x32xf32>
    %84 = vector.shape_cast %73 : vector<2x32xf32> to vector<2x4x8xf32>
    %85 = tpu.transpose %84, [1, 0, 2] : vector<2x4x8xf32> -> vector<4x2x8xf32>
    %86 = vector.shape_cast %78 : vector<10x32xf32> to vector<10x4x8xf32>
    %87 = tpu.transpose %86, [1, 0, 2] : vector<10x4x8xf32> -> vector<4x10x8xf32>
    %88 = vector.shape_cast %83 : vector<10x32xf32> to vector<10x4x8xf32>
    %89 = tpu.transpose %88, [1, 0, 2] : vector<10x4x8xf32> -> vector<4x10x8xf32>
    "tpu.trace_start"() <{level = 10 : i32, message = "hqd,hkd->hqk"}> : () -> ()
    %cst_32 = arith.constant dense<0.000000e+00> : vector<4x2x10xf32>
    %90 = tpu.matmul %85, %87, %cst_32 {dimension_numbers = #tpu.dot_dimension_numbers<[2], [2], [1], [1], [0, 0, 0, 1, 1, 1], [0], [0]>} : vector<4x2x8xf32>, vector<4x10x8xf32>, vector<4x2x10xf32> -> vector<4x2x10xf32>
    "tpu.trace_stop"() : () -> ()
    %cst_33 = arith.constant 0.353553385 : f32
    %91 = vector.broadcast %cst_33 : f32 to vector<4x2x10xf32>
    %92 = arith.mulf %90, %91 : vector<4x2x10xf32>
    %cst_34 = arith.constant dense<0xFF800000> : vector<4x2xf32>
    %93 = vector.multi_reduction <maximumf>, %92, %cst_34 [2] : vector<4x2x10xf32> to vector<4x2xf32>
    %94 = vector.shape_cast %93 : vector<4x2xf32> to vector<4x2x1xf32>
    %95 = vector.broadcast %94 : vector<4x2x1xf32> to vector<4x2x10xf32>
    %96 = arith.subf %92, %95 : vector<4x2x10xf32>
    %97 = math.exp %96 : vector<4x2x10xf32>
    %cst_35 = arith.constant dense<0.000000e+00> : vector<4x2xf32>
    %98 = vector.multi_reduction <add>, %97, %cst_35 [2] : vector<4x2x10xf32> to vector<4x2xf32>
    %99 = vector.shape_cast %98 : vector<4x2xf32> to vector<4x2x1xf32>
    %100 = vector.broadcast %99 : vector<4x2x1xf32> to vector<4x2x10xf32>
    %101 = arith.divf %97, %100 : vector<4x2x10xf32>
    "tpu.trace_start"() <{level = 10 : i32, message = "hqk,hkd->hqd"}> : () -> ()
    %cst_36 = arith.constant dense<0.000000e+00> : vector<4x2x8xf32>
    %102 = tpu.matmul %101, %89, %cst_36 {dimension_numbers = #tpu.dot_dimension_numbers<[2], [1], [1], [2], [0, 0, 0, 1, 1, 2], [0], [0]>} : vector<4x2x10xf32>, vector<4x10x8xf32>, vector<4x2x8xf32> -> vector<4x2x8xf32>
    "tpu.trace_stop"() : () -> ()
    %103 = tpu.transpose %102, [1, 0, 2] : vector<4x2x8xf32> -> vector<2x4x8xf32>
    %104 = vector.shape_cast %103 : vector<2x4x8xf32> to vector<2x32xf32>
    %c0_37 = arith.constant 0 : index
    %c0_38 = arith.constant 0 : index
    %105 = vector.load %arg11[%c0_37, %c0_38] : memref<32x32xf32, #tpu.memory_space<vmem>>, vector<32x32xf32>
    %cst_39 = arith.constant dense<0.000000e+00> : vector<2x32xf32>
    %106 = tpu.matmul %104, %105, %cst_39 {dimension_numbers = #tpu.dot_dimension_numbers<[1], [0], [0], [1], [0, 0, 1, 1], [], []>} : vector<2x32xf32>, vector<32x32xf32>, vector<2x32xf32> -> vector<2x32xf32>
    %c0_40 = arith.constant 0 : index
    %c0_41 = arith.constant 0 : index
    %107 = vector.load %arg12[%c0_40, %c0_41] : memref<1x32xf32, #tpu.memory_space<vmem>>, vector<1x32xf32>
    %108 = vector.broadcast %107 : vector<1x32xf32> to vector<2x32xf32>
    %109 = arith.addf %106, %108 : vector<2x32xf32>
    %c0_42 = arith.constant 0 : index
    %c0_43 = arith.constant 0 : index
    %110 = vector.load %arg13[%c0_42, %c0_43] : memref<2x32xf32, #tpu.memory_space<vmem>>, vector<2x32xf32>
    tpu.vector_store %arg13[%c0_42, %c0_43], %109 {strides = array<i32>} : memref<2x32xf32, #tpu.memory_space<vmem>>, vector<2x32xf32>,
    return
  }
  func.func @transform_0(%arg0: i32) -> (i32, i32, i32) {
    %c0_i32 = arith.constant 0 : i32
    %c0_i32_0 = arith.constant 0 : i32
    %c0_i32_1 = arith.constant 0 : i32
    %c0_i32_2 = arith.constant 0 : i32
    return %c0_i32, %c0_i32_0, %c0_i32_1 : i32, i32, i32
  }
  func.func @transform_1(%arg0: i32) -> (i32, i32) {
    %c0_i32 = arith.constant 0 : i32
    %c0_i32_0 = arith.constant 0 : i32
    %c0_i32_1 = arith.constant 0 : i32
    return %c0_i32, %c0_i32_0 : i32, i32
  }
  func.func @transform_2(%arg0: i32) -> (i32, i32) {
    %c0_i32 = arith.constant 0 : i32
    %c0_i32_0 = arith.constant 0 : i32
    %c0_i32_1 = arith.constant 0 : i32
    return %c0_i32, %c0_i32_0 : i32, i32
  }
  func.func @transform_3(%arg0: i32) -> (i32, i32) {
    %c0_i32 = arith.constant 0 : i32
    %c0_i32_0 = arith.constant 0 : i32
    %c0_i32_1 = arith.constant 0 : i32
    return %c0_i32, %c0_i32_0 : i32, i32
  }
  func.func @transform_4(%arg0: i32) -> (i32, i32) {
    %c0_i32 = arith.constant 0 : i32
    %c0_i32_0 = arith.constant 0 : i32
    %c0_i32_1 = arith.constant 0 : i32
    return %c0_i32, %c0_i32_0 : i32, i32
  }
  func.func @transform_5(%arg0: i32) -> (i32, i32) {
    %c0_i32 = arith.constant 0 : i32
    %c0_i32_0 = arith.constant 0 : i32
    %c0_i32_1 = arith.constant 0 : i32
    return %c0_i32, %c0_i32_0 : i32, i32
  }
  func.func @transform_6(%arg0: i32) -> (i32, i32) {
    %c0_i32 = arith.constant 0 : i32
    %c0_i32_0 = arith.constant 0 : i32
    %c0_i32_1 = arith.constant 0 : i32
    return %c0_i32, %c0_i32_0 : i32, i32
  }
  func.func @transform_7(%arg0: i32) -> (i32, i32) {
    %c0_i32 = arith.constant 0 : i32
    %c0_i32_0 = arith.constant 0 : i32
    %c0_i32_1 = arith.constant 0 : i32
    return %c0_i32, %c0_i32_0 : i32, i32
  }
  func.func @transform_8(%arg0: i32) -> (i32, i32) {
    %c0_i32 = arith.constant 0 : i32
    %c0_i32_0 = arith.constant 0 : i32
    %c0_i32_1 = arith.constant 0 : i32
    return %c0_i32, %c0_i32_0 : i32, i32
  }
  func.func @transform_9(%arg0: i32) -> (i32, i32) {
    %c0_i32 = arith.constant 0 : i32
    %c0_i32_0 = arith.constant 0 : i32
    %c0_i32_1 = arith.constant 0 : i32
    return %c0_i32, %c0_i32_0 : i32, i32
  }
  func.func @transform_10(%arg0: i32) -> (i32, i32) {
    %c0_i32 = arith.constant 0 : i32
    %c0_i32_0 = arith.constant 0 : i32
    %c0_i32_1 = arith.constant 0 : i32
    return %c0_i32, %c0_i32_0 : i32, i32
  }
  func.func @transform_11(%arg0: i32) -> (i32, i32) {
    %c0_i32 = arith.constant 0 : i32
    %c0_i32_0 = arith.constant 0 : i32
    %c0_i32_1 = arith.constant 0 : i32
    return %c0_i32, %c0_i32_0 : i32, i32
  }
  func.func @transform_12(%arg0: i32) -> (i32, i32) {
    %c0_i32 = arith.constant 0 : i32
    %c0_i32_0 = arith.constant 0 : i32
    %c0_i32_1 = arith.constant 0 : i32
    return %c0_i32, %c0_i32_0 : i32, i32
  }
}

</mosaic_0001>

<bundles_post_ra>
// kernel: style_encoder_forward.5
= control target key start
LH: loop header
LB: loop body
LE: loop exit
PB: predicated region body
PF: predicated region fallthrough
CT: control target
= control target key end

     0   :  { %vm36_vm0 = vcmask 130048   ;;  %vm166_vm1 = vcmask 31744   ;;  %s367_s1 = inlined_call_operand.vmem [shape: f32[16,4], index: 1, kind: input, shape index: {}]   ;;  %s368_s0 = inlined_call_operand.vmem [shape: f32[128,16], index: 0, kind: input, shape index: {}]   ;;  %s369_s2 = inlined_call_operand.vmem [shape: f32[1,4], index: 2, kind: input, shape index: {}]   ;;  %s370_s3 = inlined_call_operand.vmem [shape: f32[128,4], index: 3, kind: output, shape index: {}]  }
   0x1   :  { %v31_v0 = vld [vmem:[%s367_s1 + $0x8] sm:$0xff]  ;;  %v30_v1 = vld [vmem:[%s367_s1] sm:$0xff]  ;;  %v24_v10 = vld [vmem:[%s368_s0 + $0x50] sm:$0xff] }
   0x2   :  { %204 = vmatpush.msra.mxu2 %v31_v0  ;;  %205 = vmatpush.msra.mxu3 %v31_v0  ;;  %v22_v2 = vld [vmem:[%s368_s0 + $0x40] sm:$0xff]  ;;  %v23_v6 = vld [vmem:[%s368_s0 + $0x48] sm:$0xff]  ;;  %v28_v11 = vld [vmem:[%s368_s0 + $0x70] sm:$0xff] }
   0x3   :  { %v26_v3 = vld [vmem:[%s368_s0 + $0x60] sm:$0xff]  ;;  %99 = vmatpush.msra.mxu0 %v31_v0  ;;  %203 = vmatpush.msra.mxu1 %v31_v0  ;;  %v27_v7 = vld [vmem:[%s368_s0 + $0x68] sm:$0xff]  ;;  %v16_v12 = vld [vmem:[%s368_s0 + $0x10] sm:$0xff] }
   0x4   :  { %207 = vmatpush.msra.mxu2 %v30_v1  ;;  %208 = vmatpush.msra.mxu3 %v30_v1  ;;  %v14_v4 = vld [vmem:[%s368_s0] sm:$0xff]  ;;  %v15_v8 = vld [vmem:[%s368_s0 + $0x8] sm:$0xff]  ;;  %v20_v13 = vld [vmem:[%s368_s0 + $0x30] sm:$0xff] }
   0x5   :  { %v18_v5 = vld [vmem:[%s368_s0 + $0x20] sm:$0xff]  ;;  %195 = vmatmul.msk.f32.vlgmr.msra.gmra.mxu2 %vm36_vm0, %v22_v2  ;;  %199 = vmatmul.msk.f32.vlgmr.msra.gmra.mxu3 %vm36_vm0, %v26_v3  ;;  %v19_v9 = vld [vmem:[%s368_s0 + $0x28] sm:$0xff]  ;;  %v25_v14 = vld [vmem:[%s368_s0 + $0x58] sm:$0xff] }
   0x6   :  { %100 = vmatpush.msra.mxu0 %v30_v1  ;;  %206 = vmatpush.msra.mxu1 %v30_v1  ;;  %v29_v15 = vld [vmem:[%s368_s0 + $0x78] sm:$0xff]  ;;  %v209_v18 = vld [vmem:[%s369_s2] ss:$0 sm:$0xff] }
   0x7   :  { %187 = vmatmul.msk.f32.vlgmr.msra.gmra.mxu0 %vm36_vm0, %v14_v4  ;;  %191 = vmatmul.msk.f32.vlgmr.msra.gmra.mxu1 %vm36_vm0, %v18_v5  ;;  %v17_v16 = vld [vmem:[%s368_s0 + $0x18] sm:$0xff] }
   0x8   :  { %v21_v17 = vld [vmem:[%s368_s0 + $0x38] sm:$0xff] }
   0xd   :  { %196 = vmatmul.msk.f32.gmra.mxu2 %vm36_vm0, %v23_v6  ;;  %200 = vmatmul.msk.f32.gmra.mxu3 %vm36_vm0, %v27_v7 }
   0xf   :  { %188 = vmatmul.msk.f32.gmra.mxu0 %vm36_vm0, %v15_v8  ;;  %192 = vmatmul.msk.f32.gmra.mxu1 %vm36_vm0, %v19_v9 }
  0x15   :  { %197 = vmatmul.msk.f32.gmra.mxu2 %vm36_vm0, %v24_v10  ;;  %201 = vmatmul.msk.f32.gmra.mxu3 %vm36_vm0, %v28_v11 }
  0x17   :  { %189 = vmatmul.msk.f32.gmra.mxu0 %vm36_vm0, %v16_v12  ;;  %193 = vmatmul.msk.f32.gmra.mxu1 %vm36_vm0, %v20_v13 }
  0x1d   :  { %198 = vmatmul.msk.f32.gmra.mxu2 %vm36_vm0, %v25_v14  ;;  %202 = vmatmul.msk.f32.gmra.mxu3 %vm36_vm0, %v29_v15 }
  0x1f   :  { %190 = vmatmul.msk.f32.gmra.mxu0 %vm36_vm0, %v17_v16  ;;  %194 = vmatmul.msk.f32.gmra.mxu1 %vm36_vm0, %v21_v17 }
  0x84   :  { %v102_v19 = vpop.f32.mrf.mxu0  ;;  %v114_v20 = vpop.f32.mrf.mxu1 }
  0x85   :  { %v103_v21 = vadd.f32 %v209_v18, %v102_v19  ;;  %v115_v22 = vadd.f32 %v209_v18, %v114_v20 }
  0x87   :  { %v150_v23 = vmax.f32 %v103_v21, 0.0  ;;  %v154_v24 = vmax.f32 %v115_v22, 0.0 }
  0x88   :  { %v126_v25 = vpop.f32.mrf.mxu2  ;;  %v138_v26 = vpop.f32.mrf.mxu3 }
  0x89   :  { %167 = vst.msk [vmem:[%s370_s3] sm:$0xff] %vm166_vm1, %v150_v23  ;;  %v127_v27 = vadd.f32 %v209_v18, %v126_v25  ;;  %v139_v28 = vadd.f32 %v209_v18, %v138_v26 }
  0x8a   :  { %171 = vst.msk [vmem:[%s370_s3 + $0x20] sm:$0xff] %vm166_vm1, %v154_v24 }
  0x8b   :  { %v158_v29 = vmax.f32 %v127_v27, 0.0  ;;  %v162_v30 = vmax.f32 %v139_v28, 0.0 }
  0x8c   :  { %v105_v31 = vpop.f32.mrf.mxu0  ;;  %v117_v32 = vpop.f32.mrf.mxu1 }
  0x8d   :  { %175 = vst.msk [vmem:[%s370_s3 + $0x40] sm:$0xff] %vm166_vm1, %v158_v29  ;;  %v106_v33 = vadd.f32 %v209_v18, %v105_v31  ;;  %v118_v34 = vadd.f32 %v209_v18, %v117_v32 }
  0x8e   :  { %179 = vst.msk [vmem:[%s370_s3 + $0x60] sm:$0xff] %vm166_vm1, %v162_v30 }
  0x8f   :  { %v151_v35 = vmax.f32 %v106_v33, 0.0  ;;  %v155_v36 = vmax.f32 %v118_v34, 0.0 }
  0x90   :  { %v129_v37 = vpop.f32.mrf.mxu2  ;;  %v141_v38 = vpop.f32.mrf.mxu3 }
  0x91   :  { %168 = vst.msk [vmem:[%s370_s3 + $0x8] sm:$0xff] %vm166_vm1, %v151_v35  ;;  %v130_v39 = vadd.f32 %v209_v18, %v129_v37  ;;  %v142_v40 = vadd.f32 %v209_v18, %v141_v38 }
  0x92   :  { %172 = vst.msk [vmem:[%s370_s3 + $0x28] sm:$0xff] %vm166_vm1, %v155_v36 }
  0x93   :  { %v159_v41 = vmax.f32 %v130_v39, 0.0  ;;  %v163_v42 = vmax.f32 %v142_v40, 0.0 }
  0x94   :  { %v108_v43 = vpop.f32.mrf.mxu0  ;;  %v120_v44 = vpop.f32.mrf.mxu1 }
  0x95   :  { %176 = vst.msk [vmem:[%s370_s3 + $0x48] sm:$0xff] %vm166_vm1, %v159_v41  ;;  %v109_v45 = vadd.f32 %v209_v18, %v108_v43  ;;  %v121_v46 = vadd.f32 %v209_v18, %v120_v44 }
  0x96   :  { %180 = vst.msk [vmem:[%s370_s3 + $0x68] sm:$0xff] %vm166_vm1, %v163_v42 }
  0x97   :  { %v152_v47 = vmax.f32 %v109_v45, 0.0  ;;  %v156_v48 = vmax.f32 %v121_v46, 0.0 }
  0x98   :  { %v132_v49 = vpop.f32.mrf.mxu2  ;;  %v144_v50 = vpop.f32.mrf.mxu3 }
  0x99   :  { %169 = vst.msk [vmem:[%s370_s3 + $0x10] sm:$0xff] %vm166_vm1, %v152_v47  ;;  %v133_v51 = vadd.f32 %v209_v18, %v132_v49  ;;  %v145_v52 = vadd.f32 %v209_v18, %v144_v50 }
  0x9a   :  { %173 = vst.msk [vmem:[%s370_s3 + $0x30] sm:$0xff] %vm166_vm1, %v156_v48 }
  0x9b   :  { %v160_v53 = vmax.f32 %v133_v51, 0.0  ;;  %v164_v54 = vmax.f32 %v145_v52, 0.0 }
  0x9c   :  { %v111_v55 = vpop.f32.mrf.mxu0  ;;  %v123_v56 = vpop.f32.mrf.mxu1 }
  0x9d   :  { %177 = vst.msk [vmem:[%s370_s3 + $0x50] sm:$0xff] %vm166_vm1, %v160_v53  ;;  %v112_v57 = vadd.f32 %v209_v18, %v111_v55  ;;  %v124_v58 = vadd.f32 %v209_v18, %v123_v56 }
  0x9e   :  { %181 = vst.msk [vmem:[%s370_s3 + $0x70] sm:$0xff] %vm166_vm1, %v164_v54 }
  0x9f   :  { %v153_v59 = vmax.f32 %v112_v57, 0.0  ;;  %v157_v60 = vmax.f32 %v124_v58, 0.0 }
  0xa0   :  { %v135_v61 = vpop.f32.mrf.mxu2  ;;  %v147_v62 = vpop.f32.mrf.mxu3 }
  0xa1   :  { %170 = vst.msk [vmem:[%s370_s3 + $0x18] sm:$0xff] %vm166_vm1, %v153_v59  ;;  %v136_v63 = vadd.f32 %v209_v18, %v135_v61  ;;  %v148_v0 = vadd.f32 %v209_v18, %v147_v62 }
  0xa2   :  { %174 = vst.msk [vmem:[%s370_s3 + $0x38] sm:$0xff] %vm166_vm1, %v157_v60 }
  0xa3   :  { %v161_v1 = vmax.f32 %v136_v63, 0.0  ;;  %v165_v2 = vmax.f32 %v148_v0, 0.0 }
  0xa5   :  { %178 = vst.msk [vmem:[%s370_s3 + $0x58] sm:$0xff] %vm166_vm1, %v161_v1 }
  0xa6   :  { %182 = vst.msk [vmem:[%s370_s3 + $0x78] sm:$0xff] %vm166_vm1, %v165_v2 }

// kernel: style_encoder_forward.6
= control target key start
LH: loop header
LB: loop body
LE: loop exit
PB: predicated region body
PF: predicated region fallthrough
CT: control target
= control target key end

     0   :  { %vm27_vm0 = vcmask 326656   ;;  %vm73_vm1 = vcmask 64512   ;;  %s164_s1 = inlined_call_operand.vmem [shape: f32[40,8], index: 1, kind: input, shape index: {}]   ;;  %s165_s2 = inlined_call_operand.vmem [shape: f32[1,8], index: 2, kind: input, shape index: {}]   ;;  %s166_s0 = inlined_call_operand.vmem [shape: f32[32,40], index: 0, kind: input, shape index: {}]   ;;  %s167_s3 = inlined_call_operand.vmem [shape: f32[32,8], index: 3, kind: output, shape index: {}]  }
   0x1   :  { %v22_v0 = vld [vmem:[%s164_s1 + $0x20] sm:$0xff]  ;;  %v21_v1 = vld [vmem:[%s164_s1 + $0x18] sm:$0xff]  ;;  %v20_v2 = vld [vmem:[%s164_s1 + $0x10] sm:$0xff] }
   0x2   :  { %87 = vmatpush.msra.mxu2 %v22_v0  ;;  %88 = vmatpush.msra.mxu3 %v22_v0  ;;  %v19_v3 = vld [vmem:[%s164_s1 + $0x8] sm:$0xff]  ;;  %v18_v4 = vld [vmem:[%s164_s1] sm:$0xff]  ;;  %v16_v5 = vld [vmem:[%s166_s0 + $0x10] sm:$0xff] }
   0x3   :  { %51 = vmatpush.msra.mxu0 %v22_v0  ;;  %86 = vmatpush.msra.mxu1 %v22_v0  ;;  %v17_v6 = vld [vmem:[%s166_s0 + $0x18] sm:$0xff]  ;;  %v14_v7 = vld [vmem:[%s166_s0] sm:$0xff]  ;;  %v15_v8 = vld [vmem:[%s166_s0 + $0x8] sm:$0xff] }
   0x4   :  { %90 = vmatpush.msra.mxu2 %v21_v1  ;;  %91 = vmatpush.msra.mxu3 %v21_v1  ;;  %v101_v9 = vld [vmem:[%s165_s2] ss:$0 sm:$0xff] }
   0x5   :  { %52 = vmatpush.msra.mxu0 %v21_v1  ;;  %89 = vmatpush.msra.mxu1 %v21_v1 }
   0x6   :  { %93 = vmatpush.msra.mxu2 %v20_v2  ;;  %94 = vmatpush.msra.mxu3 %v20_v2 }
   0x7   :  { %53 = vmatpush.msra.mxu0 %v20_v2  ;;  %92 = vmatpush.msra.mxu1 %v20_v2 }
   0x8   :  { %96 = vmatpush.msra.mxu2 %v19_v3  ;;  %97 = vmatpush.msra.mxu3 %v19_v3 }
   0x9   :  { %54 = vmatpush.msra.mxu0 %v19_v3  ;;  %95 = vmatpush.msra.mxu1 %v19_v3 }
   0xa   :  { %99 = vmatpush.msra.mxu2 %v18_v4  ;;  %100 = vmatpush.msra.mxu3 %v18_v4 }
   0xb   :  { %84 = vmatmul.msk.f32.vlgmr.msra.gmra.mxu2 %vm27_vm0, %v16_v5  ;;  %85 = vmatmul.msk.f32.vlgmr.msra.gmra.mxu3 %vm27_vm0, %v17_v6 }
   0xc   :  { %55 = vmatpush.msra.mxu0 %v18_v4  ;;  %98 = vmatpush.msra.mxu1 %v18_v4 }
   0xd   :  { %82 = vmatmul.msk.f32.vlgmr.msra.gmra.mxu0 %vm27_vm0, %v14_v7  ;;  %83 = vmatmul.msk.f32.vlgmr.msra.gmra.mxu1 %vm27_vm0, %v15_v8 }
  0x8a   :  { %v57_v10 = vpop.f32.mrf.mxu0  ;;  %v60_v11 = vpop.f32.mrf.mxu1 }
  0x8b   :  { %v58_v12 = vadd.f32 %v101_v9, %v57_v10  ;;  %v61_v13 = vadd.f32 %v101_v9, %v60_v11 }
  0x8d   :  { %v69_v14 = vmax.f32 %v58_v12, 0.0  ;;  %v70_v15 = vmax.f32 %v61_v13, 0.0 }
  0x8e   :  { %v63_v16 = vpop.f32.mrf.mxu2  ;;  %v66_v17 = vpop.f32.mrf.mxu3 }
  0x8f   :  { %74 = vst.msk [vmem:[%s167_s3] sm:$0xff] %vm73_vm1, %v69_v14  ;;  %v64_v18 = vadd.f32 %v101_v9, %v63_v16  ;;  %v67_v19 = vadd.f32 %v101_v9, %v66_v17 }
  0x90   :  { %75 = vst.msk [vmem:[%s167_s3 + $0x8] sm:$0xff] %vm73_vm1, %v70_v15 }
  0x91   :  { %v71_v20 = vmax.f32 %v64_v18, 0.0  ;;  %v72_v21 = vmax.f32 %v67_v19, 0.0 }
  0x93   :  { %76 = vst.msk [vmem:[%s167_s3 + $0x10] sm:$0xff] %vm73_vm1, %v71_v20 }
  0x94   :  { %77 = vst.msk [vmem:[%s167_s3 + $0x18] sm:$0xff] %vm73_vm1, %v72_v21 }

// kernel: style_encoder_forward.7
= control target key start
LH: loop header
LB: loop body
LE: loop exit
PB: predicated region body
PF: predicated region fallthrough
CT: control target
= control target key end

     0   :  { %vm28_vm0 = vcmask 588800   ;;  %vm53_vm1 = vcmask 64512   ;;  %s117_s1 = inlined_call_operand.vmem [shape: f32[72,8], index: 1, kind: input, shape index: {}]   ;;  %s118_s2 = inlined_call_operand.vmem [shape: f32[1,8], index: 2, kind: input, shape index: {}]   ;;  %s119_s0 = inlined_call_operand.vmem [shape: f32[8,72], index: 0, kind: input, shape index: {}]   ;;  %s120_s3 = inlined_call_operand.vmem [shape: f32[8,8], index: 3, kind: output, shape index: {}]  }
   0x1   :  { %v23_v0 = vld [vmem:[%s117_s1 + $0x40] sm:$0xff]  ;;  %v22_v1 = vld [vmem:[%s117_s1 + $0x38] sm:$0xff]  ;;  %v21_v2 = vld [vmem:[%s117_s1 + $0x30] sm:$0xff] }
   0x2   :  { %39 = vmatpush.msra.mxu0 %v23_v0  ;;  %v20_v3 = vld [vmem:[%s117_s1 + $0x28] sm:$0xff]  ;;  %v19_v4 = vld [vmem:[%s117_s1 + $0x20] sm:$0xff]  ;;  %v18_v5 = vld [vmem:[%s117_s1 + $0x18] sm:$0xff] }
   0x3   :  { %v17_v6 = vld [vmem:[%s117_s1 + $0x10] sm:$0xff]  ;;  %v16_v7 = vld [vmem:[%s117_s1 + $0x8] sm:$0xff]  ;;  %v15_v8 = vld [vmem:[%s117_s1] sm:$0xff] }
   0x4   :  { %40 = vmatpush.msra.mxu0 %v22_v1  ;;  %v14_v9 = vld [vmem:[%s119_s0] sm:$0xff] }
   0x5   :  { %v60_v10 = vld [vmem:[%s118_s2] ss:$0 sm:$0xff] }
   0x6   :  { %41 = vmatpush.msra.mxu0 %v21_v2 }
   0x8   :  { %42 = vmatpush.msra.mxu0 %v20_v3 }
   0xa   :  { %43 = vmatpush.msra.mxu0 %v19_v4 }
   0xc   :  { %44 = vmatpush.msra.mxu0 %v18_v5 }
   0xe   :  { %45 = vmatpush.msra.mxu0 %v17_v6 }
  0x10   :  { %46 = vmatpush.msra.mxu0 %v16_v7 }
  0x12   :  { %47 = vmatpush.msra.mxu0 %v15_v8 }
  0x13   :  { %59 = vmatmul.msk.f32.vlgmr.msra.gmra.mxu0 %vm28_vm0, %v14_v9 }
  0x90   :  { %v49_v11 = vpop.f32.mrf.mxu0 }
  0x91   :  { %v50_v12 = vadd.f32 %v60_v10, %v49_v11 }
  0x93   :  { %v52_v13 = vmax.f32 %v50_v12, 0.0 }
  0x95   :  { %54 = vst.msk [vmem:[%s120_s3] sm:$0xff] %vm53_vm1, %v52_v13 }

// kernel: style_encoder_forward.8
= control target key start
LH: loop header
LB: loop body
LE: loop exit
PB: predicated region body
PF: predicated region fallthrough
CT: control target
= control target key end

     0   :  { %vm21_vm0 = vcmask 130048   ;;  %vm45_vm1 = vcmask 785408   ;;  %s88_s1 = inlined_call_operand.vmem [shape: f32[16,96], index: 1, kind: input, shape index: {}]   ;;  %s89_s0 = inlined_call_operand.vmem [shape: f32[8,16], index: 0, kind: input, shape index: {}]   ;;  %s90_s2 = inlined_call_operand.vmem [shape: f32[1,96], index: 2, kind: input, shape index: {}]   ;;  %s91_s3 = inlined_call_operand.vmem [shape: f32[8,96], index: 3, kind: output, shape index: {}]  }
   0x1   :  { %v16_v0 = vld [vmem:[%s88_s1 + $0x8] sm:$0xff]  ;;  %v15_v1 = vld [vmem:[%s88_s1] sm:$0xff] }
   0x2   :  { %39 = vmatpush.msra.mxu0 %v16_v0  ;;  %v14_v2 = vld [vmem:[%s89_s0] sm:$0xff] }
   0x3   :  { %v52_v3 = vld [vmem:[%s90_s2] ss:$0 sm:$0xff] }
   0x4   :  { %40 = vmatpush.msra.mxu0 %v15_v1 }
   0x5   :  { %51 = vmatmul.msk.f32.vlgmr.msra.gmra.mxu0 %vm21_vm0, %v14_v2 }
  0x82   :  { %v42_v4 = vpop.f32.mrf.mxu0 }
  0x83   :  { %v43_v5 = vadd.f32 %v52_v3, %v42_v4 }
  0x85   :  { %46 = vst.msk [vmem:[%s91_s3] sm:$0xff] %vm45_vm1, %v43_v5 }

// kernel: style_encoder_forward.9
= control target key start
LH: loop header
LB: loop body
LE: loop exit
PB: predicated region body
PF: predicated region fallthrough
CT: control target
= control target key end

     0   :  { %s1614_s0 = inlined_call_operand.vmem [shape: f32[2,2,96], index: 0, kind: input, shape index: {}]   ;;  %s1615_s1 = inlined_call_operand.vmem [shape: f32[32,96], index: 1, kind: input, shape index: {}]   ;;  %s1616_s2 = inlined_call_operand.vmem [shape: f32[1,96], index: 2, kind: input, shape index: {}]   ;;  %s1617_s3 = inlined_call_operand.vmem [shape: f32[10,8], index: 3, kind: input, shape index: {}]   ;;  %s1618_s4 = inlined_call_operand.vmem [shape: f32[32,32], index: 4, kind: input, shape index: {}]   ;;  %s1619_s5 = inlined_call_operand.vmem [shape: f32[1,32], index: 5, kind: input, shape index: {}]   ;;  %s1620_s6 = inlined_call_operand.vmem [shape: f32[8,32], index: 6, kind: input, shape index: {}]   ;;  %s1621_s7 = inlined_call_operand.vmem [shape: f32[1,32], index: 7, kind: input, shape index: {}]   ;;  %s1622_s8 = inlined_call_operand.vmem [shape: f32[8,32], index: 8, kind: input, shape index: {}]   ;;  %s1623_s9 = inlined_call_operand.vmem [shape: f32[1,32], index: 9, kind: input, shape index: {}]   ;;  %s1624_s10 = inlined_call_operand.vmem [shape: f32[32,32], index: 10, kind: input, shape index: {}]   ;;  %s1625_s11 = inlined_call_operand.vmem [shape: f32[1,32], index: 11, kind: input, shape index: {}]   ;;  %s1626_s12 = inlined_call_operand.hbm [shape: f32[2,32], index: 12, kind: output, shape index: {}]  }
   0x1   :  { %v45_v0 = vld [vmem:[%s1615_s1 + $0x18] sm:$0xff]  ;;  %v44_v1 = vld [vmem:[%s1615_s1 + $0x10] sm:$0xff]  ;;  %v43_v2 = vld [vmem:[%s1615_s1 + $0x8] sm:$0xff] }
   0x2   :  { %67 = vmatpush.msra.mxu0 %v45_v0  ;;  %133 = vmatpush.msra.mxu1 %v45_v0 }
   0x4   :  { %68 = vmatpush.msra.mxu0 %v44_v1  ;;  %134 = vmatpush.msra.mxu1 %v44_v1 }
   0x5   :  { %17 = vsyncpa [#allocation3], 0  ;;  %v42_v3 = vld [vmem:[%s1615_s1] sm:$0xff]  ;;  %v1221_v4 = vmov 0.0   ;;  %s1222_s13 = smov 64   ;;  %s1223_s1 = smov 96  }
   0x6   :  { %69 = vmatpush.msra.mxu0 %v43_v2  ;;  %135 = vmatpush.msra.mxu1 %v43_v2  ;;  %v1158_v5 = vld [vmem:[%s1616_s2] ss:$0 sm:$0xff]  ;;  %vm51_vm4 = vcmask 261120   ;;  %v1117_v36 = vld [vmem:[%s1614_s0 + $0x2] sm:$0x3]  ;;  %vm222_vm9 = vcmask 64512  }
   0x7   :  { %v47_v8 = vld [vmem:[%s1614_s0] sm:$0x3]  ;;  %v181_v55 = vld [vmem:[%s1617_s3 + $0x8] sm:$0x3]  ;;  %v187_v61 = vld [vmem:[%s1618_s4 + $0x18] sm:$0xff]  ;;  %s1224_s30 = smov 112  }
   0x8   :  { %70 = vmatpush.msra.mxu0 %v42_v3  ;;  %136 = vmatpush.msra.mxu1 %v42_v3  ;;  %v217_v53 = vld [vmem:[%s1620_s6] sm:$0xff]  ;;  %v186_v62 = vld [vmem:[%s1618_s4 + $0x10] sm:$0xff]  ;;  %v185_v63 = vld [vmem:[%s1618_s4 + $0x8] sm:$0xff]  ;;  %vm291_vm10 = vcmask 1047556   ;;  %vm803_vm11 = vcmask 74752   ;;  %vm904_vm12 = vcmask 1041408  }
   0x9   :  { %71 = vmatmul.f32.vlgmr.msra.gmra.mxu0 %v1221_v4  ;;  %v180_v54 = vld [vmem:[%s1617_s3] sm:$0xff]  ;;  %244 = vmatpush.msra.mxu3 %v217_v53  ;;  %s1231_s16 = smov 8   ;;  %s1232_s24 = smov [#allocation2]  }
   0xa   :  { %209 = vmatpush.msra.mxu2 %v187_v61  ;;  %v1159_v0 = vld [vmem:[%s1621_s7] ss:$0 sm:$0xff]  ;;  %s1225_s7 = smov 104   ;;  %s1105_s25 = sshll.u32 %s1232_s24, 4  ;;  %s1106_s25 = int_to_ptr.vmem [resolvable:$true] %s1105_s25 }
   0xb   :  { %v184_v2 = vld [vmem:[%s1618_s4] sm:$0xff]  ;;  %s1226_s4 = smov 120   ;;  %s1107_s27 = sshll.u32 %s1626_s12, 4  ;;  %s1108_s27 = int_to_ptr.hbm [resolvable:$true] %s1107_s27 }
   0xc   :  { %210 = vmatpush.msra.mxu2 %v186_v62 }
   0xe   :  { %211 = vmatpush.msra.mxu2 %v185_v63 }
  0x10   :  { %212 = vmatpush.msra.mxu2 %v184_v2 }
  0x86   :  { %v72_v6 = vpop.f32.mrf.mxu0 }
  0x87   :  { %v73_v7 = vadd.f32 %v1158_v5, %v72_v6 }
  0x89   :  { %96 = vrot.lane.b32.xlu0 %v73_v7, %s1222_s13  ;;  %v75_v9 = vadd.f32 %v73_v7, %v47_v8 }
  0x8b   :  { %v1116_v10 = vmul.f32 -1.442695, %v75_v9 }
  0x8d   :  { %1163 = vpow2.f32 %v1116_v10 }
  0x93   :  { %v1164_v11 = vpop.eup %1163 }
  0x94   :  { %v79_v12 = vadd.f32 1.0, %v1164_v11 }
  0x96   :  { %1165 = vrcp.f32 %v79_v12  ;;  %v91_v18 = vand.u32 2147483648, %v79_v12  ;;  %vm85_vm1 = vweird.f32 %v79_v12  ;;  %v89_v19 = vand.u32 2147483647, %v79_v12 }
  0x98   :  { %v92_v21 = vor.u32 1.1754944e-38, %v91_v18  ;;  %vm90_vm3 = vcmp.eq.f32.partialorder %v89_v19, 8.507059e+37 }
  0x9c   :  { %v1166_v13 = vpop.eup %1165 }
  0x9d   :  { %v81_v14 = vmul.f32 %v1166_v13, %v79_v12  ;;  %vm86_vm0 = vweird.f32 %v1166_v13 }
  0x9e   :  { %vm87_vm2 = vmor %vm85_vm1, %vm86_vm0  ;;  %vm900_vm1 = vcmask 80896  }
  0x9f   :  { %v82_v15 = vsub.f32 1.0, %v81_v14 }
  0xa1   :  { %v83_v16 = vmul.f32 %v1166_v13, %v82_v15 }
  0xa3   :  { %v84_v17 = vadd.f32 %v1166_v13, %v83_v16  ;;  %v1227_v16 = vmov 1983009808  }
  0xa5   :  { %v88_v20 = vsel %vm87_vm2, %v1166_v13, %v84_v17  ;;  %v294_v17 = vunpack.c.l.s4 %v1227_v16 }
  0xa6   :  { %v93_v23 = vsel %vm90_vm3, %v92_v21, %v88_v20 }
  0xa7   :  { %v106_v28 = vsub.f32 1.0, %v93_v23  ;;  %v112_v30 = vmul.f32 0.0, %v93_v23 }
  0xfb   :  { %v97_v22 = vpop.permute.xlu0 %96 }
  0xfc   :  { %v99_v24 = vmul.f32 %v97_v22, %v93_v23  ;;  %v1372_v23 = vunpack.c.0.s8 %v294_v17 }
  0xfe   :  { %101 = vrot.lane.b32.xlu0 %v99_v24, %s1222_s13 }
 0x170   :  { %v102_v25 = vpop.permute.xlu0 %101 }
 0x171   :  { %v104_v26 = vadd.f32 %v102_v25, %v47_v8 }
 0x173   :  { %1167 = vtanh.f32 %v104_v26  ;;  %v1228_v26 = vmov 1934713408  }
 0x179   :  { %v1168_v27 = vpop.eup %1167 }
 0x17a   :  { %108 = vrot.lane.b32.xlu1 %v1168_v27, %s1223_s1  ;;  %v306_v27 = vunpack.c.l.s4 %v1228_v26 }
 0x1ec   :  { %v109_v29 = vpop.permute.xlu1 %108 }
 0x1ed   :  { %v111_v31 = vmul.f32 %v109_v29, %v106_v28 }
 0x1ef   :  { %v1319_v32 = vadd.f32 %v112_v30, %v111_v31 }
 0x1f1   :  { %117 = vrot.lane.b32.xlu1 %v1319_v32, %s1223_s1 }
 0x263   :  { %v118_v33 = vpop.permute.xlu1 %117 }
 0x264   :  { %1118 = vmatmul.msk.f32.vlgmr.msra.gmra.mxu1 %vm51_vm4, %v118_v33 }
 0x2e1   :  { %v138_v34 = vpop.f32.mrf.mxu1 }
 0x2e2   :  { %v139_v35 = vadd.f32 %v1158_v5, %v138_v34  ;;  %v1380_v34 = vunpack.c.0.s8 %v306_v27 }
 0x2e4   :  { %162 = vrot.lane.b32.xlu2 %v139_v35, %s1222_s13  ;;  %v141_v37 = vadd.f32 %v1117_v36, %v139_v35 }
 0x2e6   :  { %v1119_v38 = vmul.f32 -1.442695, %v141_v37 }
 0x2e8   :  { %1169 = vpow2.f32 %v1119_v38 }
 0x2ee   :  { %v1170_v39 = vpop.eup %1169 }
 0x2ef   :  { %v145_v40 = vadd.f32 1.0, %v1170_v39 }
 0x2f1   :  { %1171 = vrcp.f32 %v145_v40  ;;  %v157_v46 = vand.u32 2147483648, %v145_v40  ;;  %vm151_vm6 = vweird.f32 %v145_v40  ;;  %v155_v47 = vand.u32 2147483647, %v145_v40 }
 0x2f2   :  { %1173 = vtanh.f32 %v180_v54 }
 0x2f3   :  { %v158_v49 = vor.u32 1.1754944e-38, %v157_v46  ;;  %vm156_vm8 = vcmp.eq.f32.partialorder %v155_v47, 8.507059e+37  ;;  %1175 = vtanh.f32 %v181_v55 }
 0x2f7   :  { %v1172_v41 = vpop.eup %1171 }
 0x2f8   :  { %v147_v42 = vmul.f32 %v1172_v41, %v145_v40  ;;  %vm152_vm5 = vweird.f32 %v1172_v41  ;;  %v1338_v56 = vpop.eup %1173 }
 0x2f9   :  { %vm153_vm7 = vmor %vm151_vm6, %vm152_vm5  ;;  %1121 = vmatmul.msk.f32.vlgmr.msra.gmra.mxu3 %vm222_vm9, %v1338_v56  ;;  %v1342_v57 = vpop.eup %1175 }
 0x2fa   :  { %v148_v43 = vsub.f32 1.0, %v147_v42 }
 0x2fc   :  { %v149_v44 = vmul.f32 %v1172_v41, %v148_v43 }
 0x2fe   :  { %v150_v45 = vadd.f32 %v1172_v41, %v149_v44 }
 0x300   :  { %v154_v48 = vsel %vm153_vm7, %v1172_v41, %v150_v45 }
 0x301   :  { %v159_v51 = vsel %vm156_vm8, %v158_v49, %v154_v48  ;;  %1122 = vmatmul.msk.f32.gmra.mxu3 %vm222_vm9, %v1342_v57 }
 0x302   :  { %v172_v4 = vsub.f32 1.0, %v159_v51  ;;  %v178_v6 = vmul.f32 %v159_v51, %v1319_v32 }
 0x33e   :  { %v163_v50 = vpop.permute.xlu2 %162 }
 0x33f   :  { %v165_v52 = vmul.f32 %v163_v50, %v159_v51 }
 0x341   :  { %167 = vrot.lane.b32.xlu2 %v165_v52, %s1222_s13 }
 0x37c   :  { %v246_v1 = vpop.f32.mrf.mxu3 }
 0x37d   :  { %v247_v3 = vadd.f32 %v1159_v0, %v246_v1 }
 0x37f   :  { %v357_v20 = vrot.slane %v247_v3, 4 }
 0x384   :  { %v249_v8 = vpop.f32.mrf.mxu3 }
 0x385   :  { %v250_v9 = vadd.f32 %v1159_v0, %v249_v8 }
 0x387   :  { %351 = vrot.lane.b32.xlu2 %v250_v9, %s1225_s7 }
 0x38f   :  { %345 = vrot.lane.b32.xlu2 %v250_v9, %s1224_s30 }
 0x39b   :  { %v168_v58 = vpop.permute.xlu2 %167 }
 0x39c   :  { %v170_v59 = vadd.f32 %v1117_v36, %v168_v58 }
 0x39e   :  { %1177 = vtanh.f32 %v170_v59 }
 0x3a4   :  { %v1178_v60 = vpop.eup %1177 }
 0x3a5   :  { %174 = vrot.lane.b32.xlu0 %v1178_v60, %s1223_s1 }
 0x3ad   :  { %343 = vrot.lane.b32.xlu0 %v247_v3, %s1224_s30 }
 0x3b5   :  { %349 = vrot.lane.b32.xlu0 %v247_v3, %s1225_s7 }
 0x3e1   :  { %v352_v11 = vpop.permute.xlu2 %351 }
 0x3e2   :  { %v417_v19 = vrot.slane %v352_v11, 4 }
 0x3e9   :  { %v346_v14 = vpop.permute.xlu2 %345 }
 0x3ea   :  { %v411_v15 = vrot.slane %v346_v14, 4 }
 0x3ec   :  { %v412_v21 = vsel %vm291_vm10, %v411_v15, %v250_v9 }
 0x3ed   :  { %v416_v30 = vperm.slane %v412_v21, %v1372_v23 }
 0x417   :  { %v175_v5 = vpop.permute.xlu0 %174 }
 0x418   :  { %v177_v7 = vmul.f32 %v175_v5, %v172_v4 }
 0x41a   :  { %v179_v10 = vadd.f32 %v178_v6, %v177_v7 }
 0x41c   :  { %193 = vrot.lane.b32.xlu1 %v179_v10, %s1223_s1 }
 0x41f   :  { %v344_v12 = vpop.permute.xlu0 %343 }
 0x420   :  { %v355_v18 = vrot.slane %v344_v12, 4  ;;  %v358_v31 = vsel %vm291_vm10, %v344_v12, %v357_v20 }
 0x421   :  { %v366_v36 = vperm.slane %v358_v31, %v1372_v23 }
 0x422   :  { %v356_v24 = vsel %vm291_vm10, %v355_v18, %v247_v3 }
 0x423   :  { %v362_v32 = vperm.slane %v356_v24, %v1372_v23  ;;  %v393_v45 = vrot.slane %v366_v36, 4 }
 0x424   :  { %339 = vrot.lane.b32.xlu1 %v250_v9, %s1226_s4 }
 0x425   :  { %v381_v39 = vrot.slane %v362_v32, 4 }
 0x427   :  { %v350_v29 = vpop.permute.xlu0 %349 }
 0x428   :  { %v367_v35 = vrot.slane %v350_v29, 4 }
 0x42c   :  { %337 = vrot.lane.b32.xlu1 %v247_v3, %s1226_s4 }
 0x48e   :  { %v194_v13 = vpop.permute.xlu1 %193 }
 0x48f   :  { %1120 = vmatmul.msk.f32.vlgmr.msra.gmra.mxu2 %vm51_vm4, %v194_v13 }
 0x496   :  { %v340_v22 = vpop.permute.xlu1 %339 }
 0x497   :  { %v418_v25 = vsel %vm291_vm10, %v417_v19, %v340_v22 }
 0x498   :  { %v422_v28 = vperm.slane %v418_v25, %v1372_v23 }
 0x49a   :  { %v423_v33 = vrot.slane %v422_v28, 4 }
 0x49c   :  { %v424_v37 = vsel %vm291_vm10, %v423_v33, %v416_v30 }
 0x49d   :  { %v428_v38 = vperm.slane %v424_v37, %v1380_v34 }
 0x49e   :  { %v338_v40 = vpop.permute.xlu1 %337 }
 0x49f   :  { %v369_v41 = vrot.slane %v338_v40, 4  ;;  %v368_v42 = vsel %vm291_vm10, %v367_v35, %v338_v40  ;;  %v486_v43 = vperm.slane %v428_v38, %v1372_v23  ;;  %v487_v44 = vrot.slane %v428_v38, 4 }
 0x4a0   :  { %v374_v46 = vperm.slane %v368_v42, %v1372_v23 }
 0x4a1   :  { %v370_v47 = vsel %vm291_vm10, %v350_v29, %v369_v41  ;;  %v488_v48 = vsel %vm291_vm10, 0.0, %v487_v44  ;;  %v495_v49 = vrot.slane %v486_v43, 4 }
 0x4a2   :  { %v378_v50 = vperm.slane %v370_v47, %v1372_v23  ;;  %v379_v51 = vrot.slane %v374_v46, 4  ;;  %v382_v52 = vsel %vm291_vm10, %v374_v46, %v381_v39  ;;  %v492_v53 = vperm.slane %v488_v48, %v1372_v23 }
 0x4a3   :  { %v390_v54 = vperm.slane %v382_v52, %v1380_v34 }
 0x4a4   :  { %v380_v55 = vsel %vm291_vm10, %v379_v51, %v362_v32  ;;  %v391_v58 = vrot.slane %v378_v50, 4  ;;  %v394_v59 = vsel %vm291_vm10, %v378_v50, %v393_v45  ;;  %v493_v60 = vrot.slane %v492_v53, 4  ;;  %v1160_v50 = vld [vmem:[%s1619_s5] ss:$0 sm:$0xff]  ;;  %s1229_s5 = smov 16  }
 0x4a5   :  { %v386_v61 = vperm.slane %v380_v55, %v1380_v34  ;;  %v402_v62 = vperm.slane %v394_v59, %v1380_v34  ;;  %v405_v63 = vrot.slane %v390_v54, 4  ;;  %v496_v0 = vsel %vm291_vm10, %v492_v53, %v495_v49  ;;  %v252_v49 = vld [vmem:[%s1622_s8] sm:$0xff] }
 0x4a6   :  { %v392_v1 = vsel %vm291_vm10, %v391_v58, %v366_v36  ;;  %v494_v2 = vsel %vm291_vm10, %v493_v60, %v486_v43  ;;  %v504_v3 = vperm.slane %v496_v0, %v1380_v34  ;;  %272 = vmatpush.msrb.mxu0 %v252_v49  ;;  %v1161_v53 = vld [vmem:[%s1623_s9] ss:$0 sm:$0xff]  ;;  %s1230_s9 = smov 24  }
 0x4a7   :  { %v398_v4 = vperm.slane %v392_v1, %v1380_v34  ;;  %v403_v5 = vrot.slane %v386_v61, 4  ;;  %v406_v6 = vsel %vm291_vm10, 0.0, %v405_v63  ;;  %v409_v7 = vrot.slane %v402_v62, 4  ;;  %1123 = vmatmul.msk.f32.vlgmr.msrb.gmra.mxu0 %vm222_vm9, %v1338_v56 }
 0x4a8   :  { %v434_v8 = vrot.slane %v406_v6, 4  ;;  %v500_v9 = vperm.slane %v494_v2, %v1380_v34  ;;  %1131 = vmatpush.xpose.msk.msrb.mxu3 %vm222_vm9, %v504_v3  ;;  %v429_v10 = vsel %vm291_vm10, %v405_v63, %v386_v61  ;;  %v507_v37 = vrot.slane %v504_v3, 4 }
 0x4a9   :  { %v407_v11 = vrot.slane %v398_v4, 4  ;;  %v410_v12 = vsel %vm291_vm10, 0.0, %v409_v7  ;;  %v440_v13 = vsel %vm291_vm10, %v409_v7, %v398_v4  ;;  %v404_v14 = vsel %vm291_vm10, 0.0, %v403_v5 }
 0x4aa   :  { %v445_v15 = vrot.slane %v410_v12, 4  ;;  %1125 = vmatpush.xpose.msk.msrb.mxu1 %vm222_vm9, %v500_v9  ;;  %v505_v16 = vrot.slane %v500_v9, 4  ;;  %v433_v17 = vperm.slane %v429_v10, %v1372_v23  ;;  %v435_v18 = vsel %vm291_vm10, %v434_v8, %v404_v14 }
 0x4ab   :  { %v408_v19 = vsel %vm291_vm10, 0.0, %v407_v11  ;;  %v439_v20 = vperm.slane %v435_v18, %v1372_v23  ;;  %v444_v21 = vperm.slane %v440_v13, %v1372_v23  ;;  %v508_v45 = vsel %vm291_vm10, 0.0, %v507_v37 }
 0x4ac   :  { %v446_v22 = vsel %vm291_vm10, %v445_v15, %v408_v19  ;;  %v506_v24 = vsel %vm291_vm10, 0.0, %v505_v16  ;;  %v453_v25 = vrot.slane %v433_v17, 4 }
 0x4ad   :  { %1128 = vmatpush.xpose.msk.msrb.mxu2 %vm222_vm9, %v506_v24  ;;  %v450_v26 = vperm.slane %v446_v22, %v1372_v23  ;;  %v451_v27 = vrot.slane %v439_v20, 4  ;;  %v465_v28 = vrot.slane %v444_v21, 4 }
 0x4ae   :  { %v454_v29 = vsel %vm291_vm10, %v439_v20, %v453_v25 }
 0x4af   :  { %v452_v30 = vsel %vm291_vm10, %v451_v27, %v433_v17  ;;  %v463_v31 = vrot.slane %v450_v26, 4  ;;  %v466_v32 = vsel %vm291_vm10, %v450_v26, %v465_v28  ;;  %v462_v35 = vperm.slane %v454_v29, %v1380_v34  ;;  %1124 = vmatmul.msk.f32.gmra.mxu0 %vm222_vm9, %v1342_v57 }
 0x4b0   :  { %v458_v33 = vperm.slane %v452_v30, %v1380_v34  ;;  %v474_v36 = vperm.slane %v466_v32, %v1380_v34 }
 0x4b1   :  { %v464_v38 = vsel %vm291_vm10, %v463_v31, %v444_v21  ;;  %v481_v46 = vrot.slane %v462_v35, 4 }
 0x4b2   :  { %v470_v39 = vperm.slane %v464_v38, %v1380_v34  ;;  %v477_v40 = vrot.slane %v458_v33, 4  ;;  %v479_v41 = vrot.slane %v474_v36, 4 }
 0x4b3   :  { %v482_v48 = vsel %vm291_vm10, %v474_v36, %v481_v46 }
 0x4b4   :  { %v475_v42 = vrot.slane %v470_v39, 4  ;;  %v478_v43 = vsel %vm291_vm10, %v470_v39, %v477_v40  ;;  %v480_v44 = vsel %vm291_vm10, %v479_v41, %v462_v35 }
 0x4b5   :  { %1129 = vmatpush.xpose.msk.msrb.mxu2 %vm222_vm9, %v478_v43  ;;  %1132 = vmatpush.xpose.msk.msrb.mxu3 %vm222_vm9, %v480_v44 }
 0x4b6   :  { %v476_v47 = vsel %vm291_vm10, %v475_v42, %v458_v33 }
 0x4b7   :  { %1126 = vmatpush.xpose.msk.msrb.mxu1 %vm222_vm9, %v476_v47 }
 0x4bb   :  { %1134 = vmatpush.xpose.msk.msra.mxu1 %vm222_vm9, %v508_v45 }
 0x4bf   :  { %1135 = vmatpush.xpose.msk.msra.mxu1 %vm222_vm9, %v482_v48 }
 0x512   :  { %v214_v51 = vpop.f32.mrf.mxu2 }
 0x513   :  { %v215_v52 = vadd.f32 %v1160_v50, %v214_v51 }
 0x515   :  { %284 = vrot.lane.b32.xlu1 %v215_v52, %s1224_s30  ;;  %281 = vrot.lane.b32.xlu0 %v215_v52, %s1226_s4 }
 0x516   :  { %287 = vrot.lane.b32.xlu2 %v215_v52, %s1225_s7 }
 0x524   :  { %v274_v56 = vpop.f32.mrf.mxu0 }
 0x525   :  { %v1454_v54 = vadd.f32 %v1161_v53, %v274_v56 }
 0x527   :  { %517 = vrot.lane.b32.xlu2 %v1454_v54, %s1224_s30  ;;  %523 = vrot.lane.b32.xlu1 %v1454_v54, %s1225_s7 }
 0x52c   :  { %v277_v57 = vpop.f32.mrf.mxu0 }
 0x52d   :  { %v1460_v58 = vadd.f32 %v1161_v53, %v277_v57 }
 0x52f   :  { %525 = vrot.lane.b32.xlu0 %v1460_v58, %s1225_s7 }
 0x570   :  { %v288_v55 = vpop.permute.xlu2 %287 }
 0x571   :  { %v297_v59 = vrot.slane %v288_v55, 4 }
 0x581   :  { %v518_v35 = vpop.permute.xlu2 %517 }
 0x587   :  { %v285_v60 = vpop.permute.xlu1 %284  ;;  %v282_v61 = vpop.permute.xlu0 %281 }
 0x588   :  { %v290_v62 = vrot.slane %v285_v60, 4  ;;  %v298_v63 = vsel %vm291_vm10, %v297_v59, %v282_v61  ;;  %v529_v61 = vrot.slane %v518_v35, 4 }
 0x589   :  { %v302_v0 = vperm.slane %v298_v63, %v1372_v23 }
 0x58a   :  { %v292_v1 = vsel %vm291_vm10, %v290_v62, %v215_v52 }
 0x58b   :  { %v296_v2 = vperm.slane %v292_v1, %v1372_v23  ;;  %v303_v3 = vrot.slane %v302_v0, 4  ;;  %v531_v1 = vrot.slane %v1454_v54, 4 }
 0x58d   :  { %v304_v4 = vsel %vm291_vm10, %v303_v3, %v296_v2 }
 0x58e   :  { %v308_v5 = vperm.slane %v304_v4, %v1380_v34  ;;  %v530_v4 = vsel %vm291_vm10, %v529_v61, %v1454_v54 }
 0x590   :  { %v312_v6 = vperm.slane %v308_v5, %v1372_v23  ;;  %v313_v7 = vrot.slane %v308_v5, 4 }
 0x592   :  { %v314_v8 = vsel %vm291_vm10, 0.0, %v313_v7  ;;  %v321_v9 = vrot.slane %v312_v6, 4  ;;  %v532_v7 = vsel %vm291_vm10, %v518_v35, %v531_v1 }
 0x593   :  { %v318_v10 = vperm.slane %v314_v8, %v1372_v23 }
 0x595   :  { %v322_v11 = vsel %vm291_vm10, %v318_v10, %v321_v9  ;;  %v319_v12 = vrot.slane %v318_v10, 4 }
 0x596   :  { %v330_v13 = vperm.slane %v322_v11, %v1380_v34  ;;  %v540_v11 = vperm.slane %v532_v7, %v1372_v23 }
 0x597   :  { %v320_v14 = vsel %vm291_vm10, %v319_v12, %v312_v6 }
 0x598   :  { %1133 = vmatmul.msk.f32.vlgmr.msrb.gmra.mxu3 %vm222_vm9, %v330_v13  ;;  %v326_v15 = vperm.slane %v320_v14, %v1380_v34  ;;  %v333_v18 = vrot.slane %v330_v13, 4 }
 0x599   :  { %v524_v36 = vpop.permute.xlu1 %523 }
 0x59a   :  { %1127 = vmatmul.msk.f32.vlgmr.msrb.gmra.mxu1 %vm222_vm9, %v326_v15  ;;  %v331_v16 = vrot.slane %v326_v15, 4  ;;  %v334_v19 = vsel %vm291_vm10, 0.0, %v333_v18  ;;  %v541_v12 = vrot.slane %v524_v36, 4 }
 0x59c   :  { %v332_v17 = vsel %vm291_vm10, 0.0, %v331_v16 }
 0x59d   :  { %1130 = vmatmul.msk.f32.vlgmr.msrb.gmra.mxu2 %vm222_vm9, %v332_v17 }
 0x5a1   :  { %v526_v33 = vpop.permute.xlu0 %525 }
 0x5a2   :  { %1136 = vmatmul.msk.f32.vlgmr.msra.gmra.mxu1 %vm222_vm9, %v334_v19  ;;  %v591_v50 = vrot.slane %v526_v33, 4 }
 0x617   :  { %v709_v20 = vpop.f32.mrf.mxu1 }
 0x618   :  { %v799_v21 = vmul.f32 0.35355338, %v709_v20 }
 0x61a   :  { %v804_v22 = vsel %vm803_vm11, %v799_v21, -inf }
 0x61b   :  { %v767_v24 = vpop.f32.mrf.mxu3  ;;  %805 = vmax.xlane.f32.xlu0 %v804_v22 }
 0x61c   :  { %v801_v25 = vmul.f32 0.35355338, %v767_v24  ;;  %v567_v24 = vrot.slane %v540_v11, 4 }
 0x61e   :  { %v810_v26 = vsel %vm803_vm11, %v801_v25, -inf }
 0x61f   :  { %811 = vmax.xlane.f32.xlu2 %v810_v26  ;;  %v796_v27 = vpop.f32.mrf.mxu1 }
 0x620   :  { %v802_v28 = vmul.f32 0.35355338, %v796_v27  ;;  %v738_v29 = vpop.f32.mrf.mxu2 }
 0x621   :  { %v800_v30 = vmul.f32 0.35355338, %v738_v29 }
 0x622   :  { %v813_v31 = vsel %vm803_vm11, %v802_v28, -inf }
 0x623   :  { %814 = vmax.xlane.f32.xlu1 %v813_v31  ;;  %v807_v32 = vsel %vm803_vm11, %v800_v30, -inf }
 0x627   :  { %808 = vmax.xlane.f32.xlu2 %v807_v32 }
 0x62f   :  { %513 = vrot.lane.b32.xlu0 %v1460_v58, %s1226_s4 }
 0x63c   :  { %511 = vrot.lane.b32.xlu1 %v1454_v54, %s1226_s4 }
 0x63f   :  { %519 = vrot.lane.b32.xlu2 %v1460_v58, %s1224_s30 }
 0x68e   :  { %v806_v37 = vpop.xlane.xlu0 %805 }
 0x68f   :  { %v816_v38 = vsub.f32 %v799_v21, %v806_v37 }
 0x691   :  { %v820_v39 = vmul.f32 1.442695, %v816_v38 }
 0x692   :  { %v812_v40 = vpop.xlane.xlu2 %811 }
 0x693   :  { %1179 = vpow2.f32 %v820_v39  ;;  %v818_v48 = vsub.f32 %v801_v25, %v812_v40 }
 0x695   :  { %v824_v52 = vmul.f32 1.442695, %v818_v48 }
 0x696   :  { %v815_v41 = vpop.xlane.xlu1 %814 }
 0x697   :  { %v819_v42 = vsub.f32 %v802_v28, %v815_v41 }
 0x699   :  { %v1493_v43 = vpop.eup %1179  ;;  %v826_v44 = vmul.f32 1.442695, %v819_v42 }
 0x69a   :  { %v809_v45 = vpop.xlane.xlu2 %808  ;;  %v828_v46 = vsel %vm803_vm11, %v1493_v43, 0.0 }
 0x69b   :  { %1181 = vpow2.f32 %v826_v44  ;;  %v817_v47 = vsub.f32 %v800_v30, %v809_v45  ;;  %829 = vadd.xlane.f32.xlu2 %v828_v46 }
 0x69d   :  { %v822_v49 = vmul.f32 1.442695, %v817_v47 }
 0x69f   :  { %1183 = vpow2.f32 %v822_v49 }
 0x6a0   :  { %1185 = vpow2.f32 %v824_v52 }
 0x6a1   :  { %v1497_v51 = vpop.eup %1181  ;;  %v514_v53 = vpop.permute.xlu0 %513 }
 0x6a2   :  { %v592_v56 = vsel %vm291_vm10, %v591_v50, %v514_v53  ;;  %v520_v57 = vpop.permute.xlu2 %519  ;;  %v837_v55 = vsel %vm803_vm11, %v1497_v51, 0.0 }
 0x6a3   :  { %v596_v59 = vperm.slane %v592_v56, %v1372_v23  ;;  %v585_v60 = vrot.slane %v520_v57, 4  ;;  %838 = vadd.xlane.f32.xlu1 %v837_v55 }
 0x6a5   :  { %v1503_v62 = vpop.eup %1183  ;;  %v597_v63 = vrot.slane %v596_v59, 4  ;;  %v586_v0 = vsel %vm291_vm10, %v585_v60, %v1460_v58  ;;  %v536_v58 = vperm.slane %v530_v4, %v1372_v23 }
 0x6a6   :  { %v590_v2 = vperm.slane %v586_v0, %v1372_v23  ;;  %v831_v3 = vsel %vm803_vm11, %v1503_v62, 0.0  ;;  %v1516_v8 = vpop.eup %1185 }
 0x6a7   :  { %832 = vadd.xlane.f32.xlu0 %v831_v3  ;;  %v834_v16 = vsel %vm803_vm11, %v1516_v8, 0.0  ;;  %v555_v17 = vrot.slane %v536_v58, 4 }
 0x6a8   :  { %v598_v5 = vsel %vm291_vm10, %v597_v63, %v590_v2 }
 0x6a9   :  { %v602_v6 = vperm.slane %v598_v5, %v1380_v34 }
 0x6ab   :  { %v660_v9 = vperm.slane %v602_v6, %v1372_v23  ;;  %v661_v10 = vrot.slane %v602_v6, 4 }
 0x6ad   :  { %v662_v13 = vsel %vm291_vm10, 0.0, %v661_v10  ;;  %v669_v14 = vrot.slane %v660_v9, 4 }
 0x6ae   :  { %v666_v54 = vperm.slane %v662_v13, %v1372_v23  ;;  %v512_v15 = vpop.permute.xlu1 %511 }
 0x6af   :  { %v542_v18 = vsel %vm291_vm10, %v541_v12, %v512_v15  ;;  %v543_v19 = vrot.slane %v512_v15, 4  ;;  %835 = vadd.xlane.f32.xlu0 %v834_v16 }
 0x6b0   :  { %v548_v20 = vperm.slane %v542_v18, %v1372_v23  ;;  %v670_v21 = vsel %vm291_vm10, %v666_v54, %v669_v14  ;;  %v667_v22 = vrot.slane %v666_v54, 4 }
 0x6b1   :  { %v544_v25 = vsel %vm291_vm10, %v524_v36, %v543_v19  ;;  %v678_v26 = vperm.slane %v670_v21, %v1380_v34 }
 0x6b2   :  { %v552_v27 = vperm.slane %v544_v25, %v1372_v23  ;;  %v553_v28 = vrot.slane %v548_v20, 4  ;;  %v556_v29 = vsel %vm291_vm10, %v548_v20, %v555_v17  ;;  %v668_v30 = vsel %vm291_vm10, %v667_v22, %v660_v9 }
 0x6b3   :  { %v564_v31 = vperm.slane %v556_v29, %v1380_v34  ;;  %1141 = vmatpush.msk.msra.mxu0 %vm904_vm12, %v678_v26  ;;  %v674_v32 = vperm.slane %v668_v30, %v1380_v34  ;;  %v681_v33 = vrot.slane %v678_v26, 4 }
 0x6b4   :  { %v554_v35 = vsel %vm291_vm10, %v553_v28, %v536_v58  ;;  %v565_v37 = vrot.slane %v552_v27, 4  ;;  %v568_v36 = vsel %vm291_vm10, %v552_v27, %v567_v24 }
 0x6b5   :  { %v560_v38 = vperm.slane %v554_v35, %v1380_v34  ;;  %v576_v39 = vperm.slane %v568_v36, %v1380_v34  ;;  %v579_v40 = vrot.slane %v564_v31, 4  ;;  %1137 = vmatpush.msk.msra.mxu2 %vm904_vm12, %v674_v32  ;;  %v682_v41 = vsel %vm291_vm10, 0.0, %v681_v33 }
 0x6b6   :  { %v566_v42 = vsel %vm291_vm10, %v565_v37, %v540_v11  ;;  %1143 = vmatpush.msk.msrb.mxu1 %vm904_vm12, %v682_v41  ;;  %v679_v44 = vrot.slane %v674_v32, 4 }
 0x6b7   :  { %v572_v45 = vperm.slane %v566_v42, %v1380_v34  ;;  %v577_v46 = vrot.slane %v560_v38, 4  ;;  %v580_v47 = vsel %vm291_vm10, 0.0, %v579_v40  ;;  %v583_v48 = vrot.slane %v576_v39, 4 }
 0x6b8   :  { %v603_v49 = vsel %vm291_vm10, %v579_v40, %v560_v38  ;;  %v608_v50 = vrot.slane %v580_v47, 4  ;;  %v680_v52 = vsel %vm291_vm10, 0.0, %v679_v44 }
 0x6b9   :  { %v578_v53 = vsel %vm291_vm10, 0.0, %v577_v46  ;;  %v581_v56 = vrot.slane %v572_v45, 4  ;;  %v584_v57 = vsel %vm291_vm10, 0.0, %v583_v48  ;;  %v607_v55 = vperm.slane %v603_v49, %v1372_v23  ;;  %1139 = vmatpush.msk.msra.mxu3 %vm904_vm12, %v680_v52 }
 0x6ba   :  { %v619_v59 = vrot.slane %v584_v57, 4  ;;  %v609_v60 = vsel %vm291_vm10, %v608_v50, %v578_v53  ;;  %v614_v61 = vsel %vm291_vm10, %v583_v48, %v572_v45 }
 0x6bb   :  { %v582_v63 = vsel %vm291_vm10, 0.0, %v581_v56  ;;  %v613_v0 = vperm.slane %v609_v60, %v1372_v23  ;;  %v618_v1 = vperm.slane %v614_v61, %v1372_v23  ;;  %v627_v2 = vrot.slane %v607_v55, 4 }
 0x6bc   :  { %v620_v3 = vsel %vm291_vm10, %v619_v59, %v582_v63 }
 0x6bd   :  { %v624_v4 = vperm.slane %v620_v3, %v1372_v23  ;;  %v628_v5 = vsel %vm291_vm10, %v613_v0, %v627_v2  ;;  %v639_v6 = vrot.slane %v618_v1, 4  ;;  %v625_v7 = vrot.slane %v613_v0, 4 }
 0x6be   :  { %v636_v58 = vperm.slane %v628_v5, %v1380_v34 }
 0x6bf   :  { %v640_v9 = vsel %vm291_vm10, %v624_v4, %v639_v6  ;;  %v626_v10 = vsel %vm291_vm10, %v625_v7, %v607_v55  ;;  %v637_v11 = vrot.slane %v624_v4, 4 }
 0x6c0   :  { %v648_v12 = vperm.slane %v640_v9, %v1380_v34  ;;  %v655_v13 = vrot.slane %v636_v58, 4  ;;  %v632_v14 = vperm.slane %v626_v10, %v1380_v34 }
 0x6c1   :  { %v638_v54 = vsel %vm291_vm10, %v637_v11, %v618_v1 }
 0x6c2   :  { %v656_v15 = vsel %vm291_vm10, %v648_v12, %v655_v13  ;;  %v644_v16 = vperm.slane %v638_v54, %v1380_v34  ;;  %v651_v17 = vrot.slane %v632_v14, 4  ;;  %v653_v18 = vrot.slane %v648_v12, 4 }
 0x6c3   :  { %1001 = vmatpush.msrb.mxu1 %v656_v15 }
 0x6c4   :  { %v652_v19 = vsel %vm291_vm10, %v644_v16, %v651_v17  ;;  %v654_v20 = vsel %vm291_vm10, %v653_v18, %v636_v58  ;;  %v649_v21 = vrot.slane %v644_v16, 4 }
 0x6c5   :  { %949 = vmatpush.msra.mxu3 %v652_v19  ;;  %975 = vmatpush.msra.mxu0 %v654_v20 }
 0x6c6   :  { %v650_v22 = vsel %vm291_vm10, %v649_v21, %v632_v14 }
 0x6c7   :  { %923 = vmatpush.msra.mxu2 %v650_v22 }
 0x70e   :  { %v830_v24 = vpop.xlane.xlu2 %829 }
 0x70f   :  { %1187 = vrcp.f32 %v830_v24  ;;  %v851_v29 = vand.u32 2147483648, %v830_v24  ;;  %v849_v31 = vand.u32 2147483647, %v830_v24  ;;  %vm845_vm14 = vweird.f32 %v830_v24 }
 0x711   :  { %v852_v37 = vor.u32 1.1754944e-38, %v851_v29  ;;  %vm850_vm0 = vcmp.eq.f32.partialorder %v849_v31, 8.507059e+37 }
 0x715   :  { %v1188_v25 = vpop.eup %1187 }
 0x716   :  { %v841_v26 = vmul.f32 %v1188_v25, %v830_v24  ;;  %v839_v27 = vpop.xlane.xlu1 %838  ;;  %vm846_vm13 = vweird.f32 %v1188_v25 }
 0x717   :  { %1189 = vrcp.f32 %v839_v27  ;;  %vm847_vm15 = vmor %vm845_vm14, %vm846_vm13  ;;  %v894_v44 = vand.u32 2147483647, %v839_v27  ;;  %v896_v45 = vand.u32 2147483648, %v839_v27  ;;  %vm890_vm3 = vweird.f32 %v839_v27 }
 0x718   :  { %v842_v28 = vsub.f32 1.0, %v841_v26 }
 0x719   :  { %vm895_vm6 = vcmp.eq.f32.partialorder %v894_v44, 8.507059e+37  ;;  %v897_v52 = vor.u32 1.1754944e-38, %v896_v45 }
 0x71a   :  { %v843_v30 = vmul.f32 %v1188_v25, %v842_v28  ;;  %v833_v32 = vpop.xlane.xlu0 %832 }
 0x71b   :  { %1191 = vrcp.f32 %v833_v32  ;;  %v866_v53 = vand.u32 2147483648, %v833_v32  ;;  %vm860_vm8 = vweird.f32 %v833_v32 }
 0x71c   :  { %v844_v33 = vadd.f32 %v1188_v25, %v843_v30 }
 0x71d   :  { %v1190_v35 = vpop.eup %1189  ;;  %v867_v63 = vor.u32 1.1754944e-38, %v866_v53 }
 0x71e   :  { %v848_v36 = vsel %vm847_vm15, %v1188_v25, %v844_v33  ;;  %v886_v38 = vmul.f32 %v1190_v35, %v839_v27  ;;  %vm891_vm2 = vweird.f32 %v1190_v35 }
 0x71f   :  { %v853_v39 = vsel %vm850_vm0, %v852_v37, %v848_v36  ;;  %vm892_vm5 = vmor %vm890_vm3, %vm891_vm2  ;;  %vm1098_vm2 = vcmask 254976  }
 0x720   :  { %v887_v40 = vsub.f32 1.0, %v886_v38  ;;  %v854_v41 = vmul.f32 %v1493_v43, %v853_v39  ;;  %v864_v43 = vand.u32 2147483647, %v833_v32  ;;  %v1069_v38 = vld [vmem:[%s1624_s10 + $0x10] sm:$0xff]  ;;  %v1067_v39 = vld [vmem:[%s1624_s10] sm:$0xff] }
 0x721   :  { %v1192_v42 = vpop.eup %1191 }
 0x722   :  { %v888_v46 = vmul.f32 %v1190_v35, %v887_v40  ;;  %v856_v47 = vmul.f32 %v1192_v42, %v833_v32  ;;  %v836_v48 = vpop.xlane.xlu0 %835  ;;  %1138 = vmatmul.msk.f32.vlgmr.msra.gmra.mxu2 %vm900_vm1, %v854_v41  ;;  %vm861_vm7 = vweird.f32 %v1192_v42  ;;  %vm865_vm12 = vcmp.eq.f32.partialorder %v864_v43, 8.507059e+37 }
 0x723   :  { %1193 = vrcp.f32 %v836_v48  ;;  %vm862_vm11 = vmor %vm860_vm8, %vm861_vm7  ;;  %v881_v5 = vand.u32 2147483648, %v836_v48  ;;  %v879_v7 = vand.u32 2147483647, %v836_v48  ;;  %vm875_vm14 = vweird.f32 %v836_v48 }
 0x724   :  { %v889_v49 = vadd.f32 %v1190_v35, %v888_v46  ;;  %v857_v50 = vsub.f32 1.0, %v856_v47  ;;  %v1162_v47 = vld [vmem:[%s1625_s11] ss:$0 sm:$0xff] }
 0x725   :  { %vm880_vm0 = vcmp.eq.f32.partialorder %v879_v7, 8.507059e+37 }
 0x726   :  { %v893_v56 = vsel %vm892_vm5, %v1190_v35, %v889_v49  ;;  %v858_v57 = vmul.f32 %v1192_v42, %v857_v50 }
 0x727   :  { %v898_v55 = vsel %vm895_vm6, %v897_v52, %v893_v56 }
 0x728   :  { %v859_v59 = vadd.f32 %v1192_v42, %v858_v57  ;;  %v899_v60 = vmul.f32 %v1497_v51, %v898_v55  ;;  %v882_v51 = vor.u32 1.1754944e-38, %v881_v5 }
 0x729   :  { %v1194_v61 = vpop.eup %1193 }
 0x72a   :  { %v863_v0 = vsel %vm862_vm11, %v1192_v42, %v859_v59  ;;  %v871_v1 = vmul.f32 %v1194_v61, %v836_v48  ;;  %1144 = vmatmul.msk.f32.vlgmr.msrb.gmra.mxu1 %vm900_vm1, %v899_v60  ;;  %vm876_vm13 = vweird.f32 %v1194_v61 }
 0x72b   :  { %v868_v2 = vsel %vm865_vm12, %v867_v63, %v863_v0  ;;  %vm877_vm15 = vmor %vm875_vm14, %vm876_vm13 }
 0x72c   :  { %v872_v3 = vsub.f32 1.0, %v871_v1  ;;  %v869_v4 = vmul.f32 %v1503_v62, %v868_v2 }
 0x72e   :  { %v873_v6 = vmul.f32 %v1194_v61, %v872_v3  ;;  %1140 = vmatmul.msk.f32.vlgmr.msra.gmra.mxu3 %vm900_vm1, %v869_v4 }
 0x730   :  { %v874_v58 = vadd.f32 %v1194_v61, %v873_v6 }
 0x732   :  { %v878_v9 = vsel %vm877_vm15, %v1194_v61, %v874_v58 }
 0x733   :  { %v883_v10 = vsel %vm880_vm0, %v882_v51, %v878_v9 }
 0x734   :  { %v884_v11 = vmul.f32 %v1516_v8, %v883_v10 }
 0x736   :  { %1142 = vmatmul.msk.f32.vlgmr.msra.gmra.mxu0 %vm900_vm1, %v884_v11  ;;  %vm1065_vm1 = vcmask 195584  }
 0x7a5   :  { %v925_v17 = vpop.f32.mrf.mxu2 }
 0x7a7   :  { %v1003_v12 = vpop.f32.mrf.mxu1 }
 0x7a8   :  { %v1012_v13 = vrot.slane %v1003_v12, 4 }
 0x7b1   :  { %v951_v62 = vpop.f32.mrf.mxu3 }
 0x7b2   :  { %v1013_v14 = vsel %vm291_vm10, %v1012_v13, %v951_v62 }
 0x7b3   :  { %v1017_v54 = vperm.slane %v1013_v14, %v1372_v23  ;;  %v977_v15 = vpop.f32.mrf.mxu0 }
 0x7b4   :  { %v1006_v16 = vrot.slane %v977_v15, 4 }
 0x7b5   :  { %v1018_v19 = vrot.slane %v1017_v54, 4 }
 0x7b6   :  { %v1007_v18 = vsel %vm291_vm10, %v1006_v16, %v925_v17 }
 0x7b7   :  { %v1011_v20 = vperm.slane %v1007_v18, %v1372_v23 }
 0x7b9   :  { %v1019_v21 = vsel %vm291_vm10, %v1018_v19, %v1011_v20 }
 0x7ba   :  { %v1023_v8 = vperm.slane %v1019_v21, %v1380_v34 }
 0x7bc   :  { %v1027_v22 = vperm.slane %v1023_v8, %v1372_v23  ;;  %v1028_v24 = vrot.slane %v1023_v8, 4 }
 0x7be   :  { %v1029_v25 = vsel %vm291_vm10, 0.0, %v1028_v24  ;;  %v1036_v26 = vrot.slane %v1027_v22, 4 }
 0x7bf   :  { %v1033_v27 = vperm.slane %v1029_v25, %v1372_v23  ;;  %v1070_v23 = vld [vmem:[%s1624_s10 + $0x18] sm:$0xff] }
 0x7c0   :  { %1090 = vmatpush.msrb.mxu2 %v1070_v23 }
 0x7c1   :  { %v1037_v28 = vsel %vm291_vm10, %v1033_v27, %v1036_v26  ;;  %v1034_v29 = vrot.slane %v1033_v27, 4 }
 0x7c2   :  { %v1045_v30 = vperm.slane %v1037_v28, %v1380_v34  ;;  %1091 = vmatpush.msrb.mxu2 %v1069_v38 }
 0x7c3   :  { %v1035_v31 = vsel %vm291_vm10, %v1034_v29, %v1027_v22 }
 0x7c4   :  { %1055 = vrot.lane.b32.xlu1 %v1045_v30, %s1229_s5  ;;  %v1048_v32 = vrot.slane %v1045_v30, 4  ;;  %v1041_v33 = vperm.slane %v1035_v31, %v1380_v34  ;;  %v1068_v34 = vld [vmem:[%s1624_s10 + $0x8] sm:$0xff] }
 0x7c5   :  { %1092 = vmatpush.msrb.mxu2 %v1068_v34 }
 0x7c6   :  { %v1049_v35 = vsel %vm291_vm10, 0.0, %v1048_v32  ;;  %v1046_v37 = vrot.slane %v1041_v33, 4 }
 0x7c7   :  { %1059 = vrot.lane.b32.xlu0 %v1049_v35, %s1230_s9  ;;  %1093 = vmatpush.msrb.mxu2 %v1067_v39 }
 0x7c8   :  { %v1047_v36 = vsel %vm291_vm10, 0.0, %v1046_v37  ;;  %vm1063_vm10 = vcmask 130048  }
 0x7c9   :  { %1051 = vrot.lane.b32.xlu2 %v1047_v36, %s1231_s16 }
 0x823   :  { %v1052_v40 = vpop.permute.xlu2 %1051 }
 0x824   :  { %v1062_v42 = vsel %vm222_vm9, %v1041_v33, %v1052_v40 }
 0x836   :  { %v1056_v41 = vpop.permute.xlu1 %1055 }
 0x837   :  { %v1064_v44 = vsel %vm1063_vm10, %v1062_v42, %v1056_v41 }
 0x839   :  { %v1060_v45 = vpop.permute.xlu0 %1059 }
 0x83a   :  { %v1066_v46 = vsel %vm1065_vm1, %v1064_v44, %v1060_v45 }
 0x83b   :  { %1145 = vmatmul.msk.f32.vlgmr.msrb.gmra.mxu2 %vm51_vm4, %v1066_v46 }
 0x8be   :  { %v1095_v48 = vpop.f32.mrf.mxu2 }
 0x8bf   :  { %v1096_v49 = vadd.f32 %v1162_v47, %v1095_v48 }
 0x8c1   :  { %1099 = vst.msk [vmem:[#allocation2] sm:$0x3] %vm1098_vm2, %v1096_v49 }
 0x8c2   :  { %1110 = dma.vmem_to_hbm [thread:$0]  %s1106_s25, 32, %s1108_s27, [#allocation3]  }
 0x8c3   :  { %1219 = dma.done.wait [#allocation3], 32  }
 0x8c4   :  { %1220 = vsyncadd [#allocation3], 4294967264 }
 0x8c5   :  { %1115 = vsyncpa [#allocation3], 1 }

</bundles_post_ra>
